<compile_context>
chip_gen: v6e
topology: v6e:2x2x1
jax: 0.10.0
libtpu: 0.0.40
codegen_flags: <defaults>
</compile_context>

<pallas_src>
import functools

import jax
import jax.numpy as jnp
from jax.experimental import pallas as pl
from jax.experimental.pallas import tpu as pltpu


# ----------------------------------------------------------------------------
# helpers
# ----------------------------------------------------------------------------
def dft_matrices(n, dtype=jnp.bfloat16):
    """Orthonormal DFT matrix split into (re, im, -im).  F[j,k]=e^{-2πi jk/n}/√n."""
    idx = jnp.arange(n, dtype=jnp.float32)
    ang = -2.0 * jnp.pi * jnp.outer(idx, idx) / n
    scale = 1.0 / jnp.sqrt(jnp.float32(n))
    re = (jnp.cos(ang) * scale).astype(dtype)
    im = (jnp.sin(ang) * scale).astype(dtype)
    return re, im, (-im).astype(dtype)


def col_diff_matrix(n, dtype=jnp.float32):
    """D such that (x @ D)[i,j] = x[i,j+1]-x[i,j] for j<n-1, and 0 at j=n-1."""
    j = jnp.arange(n)
    d = (jnp.equal(j[:, None], j[None, :] + 1).astype(dtype)
         - jnp.equal(j[:, None], j[None, :]).astype(dtype))
    return d * (j[None, :] < n - 1).astype(dtype)


def row_diff_matrix(n, dtype=jnp.float32):
    """G such that (G @ x)[i,j] = x[i+1,j]-x[i,j] for i<n-1, and 0 at i=n-1."""
    i = jnp.arange(n)
    g = (jnp.equal(i[None, :], i[:, None] + 1).astype(dtype)
         - jnp.equal(i[None, :], i[:, None]).astype(dtype))
    return g * (i[:, None] < n - 1).astype(dtype)


def _cmm(ar, ai, br, bi):
    """Plain 4-multiply complex matmul; bf16 MXU inputs, f32 accumulation."""
    rr = (jnp.dot(ar, br, preferred_element_type=jnp.float32)
          - jnp.dot(ai, bi, preferred_element_type=jnp.float32))
    ri = (jnp.dot(ar, bi, preferred_element_type=jnp.float32)
          + jnp.dot(ai, br, preferred_element_type=jnp.float32))
    return rr, ri


def _dft2(xr, xi, fhr, fhi, fwr, fwi):
    """2-D (orthonormal) DFT as two complex matmuls: Fh @ x @ Fw (bf16 inputs)."""
    tr, ti = _cmm(fhr, fhi, xr, xi)
    return _cmm(tr.astype(jnp.bfloat16), ti.astype(jnp.bfloat16), fwr, fwi)


# ----------------------------------------------------------------------------
# Pallas kernels
# ----------------------------------------------------------------------------
def expand_dc_reduce_kernel(ir_ref, ii_ref, sr_ref, si_ref, kur_ref, kui_ref,
                            m_ref, fhr_ref, fhi_ref, fhc_ref,
                            fwr_ref, fwi_ref, fwc_ref,
                            tkr_ref, tki_ref, t1r_ref, t1i_ref):
    """Per (batch, coil) step: sens_expand -> DC residual -> sens_reduce accumulate."""
    c = pl.program_id(1)
    ir = ir_ref[...]; ii = ii_ref[...]            # target image (H, W) f32
    sr = sr_ref[...]; si = si_ref[...]            # sens map of this coil
    m = m_ref[...]
    # x = img * sens_c  (complex elementwise)
    xr = ir * sr - ii * si
    xi = ir * si + ii * sr
    # K_c = Fh @ x @ Fw   (forward orthonormal 2-D DFT on the MXU)
    # TODO(synk): utils.fft2c shift convention unknown; plain orthonormal DFT.
    kr, ki = _dft2(xr.astype(jnp.bfloat16), xi.astype(jnp.bfloat16),
                   fhr_ref[...], fhi_ref[...], fwr_ref[...], fwi_ref[...])
    tkr_ref[...] = kr.astype(jnp.bfloat16)        # bf16 writeback (feeds CNN only)
    tki_ref[...] = ki.astype(jnp.bfloat16)
    # data-consistency residual: mask * (mask * K_c - Ku_c)
    rr = m * (m * kr - kur_ref[...])
    ri = m * (m * ki - kui_ref[...])
    # inverse 2-D DFT (conjugate matrices, pre-negated outside the kernel)
    vr, vi = _dft2(rr.astype(jnp.bfloat16), ri.astype(jnp.bfloat16),
                   fhr_ref[...], fhc_ref[...], fwr_ref[...], fwc_ref[...])
    # accumulate conj(sens_c) * v over coils into the resident output block
    ar = sr * vr + si * vi
    ai = sr * vi - si * vr

    @pl.when(c == 0)
    def _():
        t1r_ref[...] = ar
        t1i_ref[...] = ai

    @pl.when(c > 0)
    def _():
        t1r_ref[...] += ar
        t1i_ref[...] += ai


def reduce_update_kernel(cr_ref, ci_ref, sr_ref, si_ref,
                         t1r_ref, t1i_ref, tir_ref, tii_ref,
                         rir_ref, rii_ref,
                         fhr_ref, fhc_ref, fwr_ref, fwc_ref,
                         gh_ref, gw_ref,
                         vw_ref, vb_ref, step_ref,
                         or_ref, oi_ref,
                         t2r_acc, t2i_acc, *, scale):
    """Per (batch, coil) step: sens_reduce(output_CNN) accumulate; on the last
    coil: ViT stand-in (rss / gradients fused) + gradient-descent update."""
    c = pl.program_id(1)
    nc = pl.num_programs(1)
    # inverse 2-D DFT of the CNN output for this coil (inputs already bf16)
    vr, vi = _dft2(cr_ref[...], ci_ref[...],
                   fhr_ref[...], fhc_ref[...], fwr_ref[...], fwc_ref[...])
    sr = sr_ref[...]; si = si_ref[...]
    ar = sr * vr + si * vi
    ai = sr * vi - si * vr

    @pl.when(c == 0)
    def _():
        t2r_acc[...] = ar
        t2i_acc[...] = ai

    @pl.when(c > 0)
    def _():
        t2r_acc[...] += ar
        t2i_acc[...] += ai

    @pl.when(c == nc - 1)
    def _():
        tir = tir_ref[...]; tii = tii_ref[...]
        rir = rir_ref[...]; rii = rii_ref[...]
        # TODO(synk): utils.rss / utils.gradient not provided; sqrt-sum-of-squares
        # over (re, im) and first-order forward differences (exact, f32, via MXU).
        rss = jnp.sqrt(rir * rir + rii * rii)
        gx = jnp.dot(rss, gw_ref[...], preferred_element_type=jnp.float32)
        gy = jnp.dot(gh_ref[...], rss, preferred_element_type=jnp.float32)
        # TODO(synk): ViT.ViT (windowed attention) source unavailable; per-pixel
        # linear map over [ti_re, ti_im, ri_re, ri_im, gx, gy] as stand-in.
        vit_r = (vb_ref[0]
                 + vw_ref[0, 0] * tir + vw_ref[0, 1] * tii
                 + vw_ref[0, 2] * rir + vw_ref[0, 3] * rii
                 + vw_ref[0, 4] * gx + vw_ref[0, 5] * gy)
        vit_i = (vb_ref[1]
                 + vw_ref[1, 0] * tir + vw_ref[1, 1] * tii
                 + vw_ref[1, 2] * rir + vw_ref[1, 3] * rii
                 + vw_ref[1, 4] * gx + vw_ref[1, 5] * gy)
        step = step_ref[0]
        # Target_img_f - stepsize * (2*term1 + scale*term2 + scale*ViT)
        or_ref[...] = tir - step * (2.0 * t1r_ref[...]
                                    + scale * t2r_acc[...] + scale * vit_r)
        oi_ref[...] = tii - step * (2.0 * t1i_ref[...]
                                    + scale * t2i_acc[...] + scale * vit_i)


def cnn_mlp_kernel(rkr_ref, rki_ref, tkr_ref, tki_ref,
                   w1a_ref, w1b_ref, w1c_ref, w1d_ref, b1_ref,
                   w2r_ref, w2i_ref, b2r_ref, b2i_ref,
                   or_ref, oi_ref, *, negative_slope):
    """Fused 1x1-conv stack on native (B, C, H*W) layout (no transposes):
    h = W1 @ [rk_re; rk_im; tk_re; tk_im] + b1 -> LeakyReLU -> W2 @ h + b2."""
    h = (jnp.dot(w1a_ref[...], rkr_ref[...].astype(jnp.bfloat16),
                 preferred_element_type=jnp.float32)
         + jnp.dot(w1b_ref[...], rki_ref[...].astype(jnp.bfloat16),
                   preferred_element_type=jnp.float32)
         + jnp.dot(w1c_ref[...], tkr_ref[...], preferred_element_type=jnp.float32)
         + jnp.dot(w1d_ref[...], tki_ref[...], preferred_element_type=jnp.float32)
         + b1_ref[...])
    h = jnp.where(h >= 0.0, h, negative_slope * h).astype(jnp.bfloat16)
    or_ref[...] = (jnp.dot(w2r_ref[...], h, preferred_element_type=jnp.float32)
                   + b2r_ref[...]).astype(jnp.bfloat16)
    oi_ref[...] = (jnp.dot(w2i_ref[...], h, preferred_element_type=jnp.float32)
                   + b2i_ref[...]).astype(jnp.bfloat16)


# ----------------------------------------------------------------------------
# wrappers
# ----------------------------------------------------------------------------
def expand_dc_reduce(img_re, img_im, s_re, s_im, ku_re, ku_im, mask, fh, fw):
    """Target_Kspace_f = FFT2(img*sens); t1 = sum_c conj(s_c)*IFFT2(m*(m*K_c-Ku_c))."""
    B, C, H, W = s_re.shape
    fh_re, fh_im, fh_ng = fh
    fw_re, fw_im, fw_ng = fw
    img_spec = pl.BlockSpec((None, None, H, W), lambda b, c: (b, 0, 0, 0))
    coil_spec = pl.BlockSpec((None, None, H, W), lambda b, c: (b, c, 0, 0))
    mh = pl.BlockSpec((H, H), lambda b, c: (0, 0))
    mw = pl.BlockSpec((W, W), lambda b, c: (0, 0))
    out_shape = (jax.ShapeDtypeStruct((B, C, H, W), jnp.bfloat16),
                 jax.ShapeDtypeStruct((B, C, H, W), jnp.bfloat16),
                 jax.ShapeDtypeStruct((B, 1, H, W), jnp.float32),
                 jax.ShapeDtypeStruct((B, 1, H, W), jnp.float32))
    flops = 16 * H * W * (H + W) * B * C + 30 * B * C * H * W
    bytes_acc = (4 * (3 * B + 4 * B * C) * H * W           # ti, mask, sens, ku (f32)
                 + 2 * 2 * B * C * H * W                   # tk out (bf16)
                 + 2 * 4 * B * H * W                       # t1 out (f32)
                 + 2 * 3 * (H * H + W * W))                # DFT factors (bf16)
    return pl.pallas_call(
        expand_dc_reduce_kernel,
        out_shape=out_shape,
        grid=(B, C),
        in_specs=[img_spec, img_spec, coil_spec, coil_spec, coil_spec, coil_spec,
                  img_spec, mh, mh, mh, mw, mw, mw],
        out_specs=(coil_spec, coil_spec, img_spec, img_spec),
        compiler_params=pltpu.CompilerParams(
            dimension_semantics=("parallel", "arbitrary"),
            vmem_limit_bytes=48 * 1024 * 1024),
        cost_estimate=pl.CostEstimate(flops=flops, transcendentals=0,
                                      bytes_accessed=bytes_acc),
    )(img_re, img_im, s_re, s_im, ku_re, ku_im, mask,
      fh_re, fh_im, fh_ng, fw_re, fw_im, fw_ng)


def reduce_update(cnn_re, cnn_im, s_re, s_im, t1_re, t1_im, ti_re, ti_im,
                  ri_re, ri_im, fh, fw, gh, gw, vit_w, vit_b, stepsize, scale):
    """term2 = sens_reduce(output_CNN); out = ti - step*(2*t1 + scale*t2 + scale*ViT)."""
    B, C, H, W = s_re.shape
    fh_re, _, fh_ng = fh
    fw_re, _, fw_ng = fw
    img_spec = pl.BlockSpec((None, None, H, W), lambda b, c: (b, 0, 0, 0))
    coil_spec = pl.BlockSpec((None, None, H, W), lambda b, c: (b, c, 0, 0))
    mh = pl.BlockSpec((H, H), lambda b, c: (0, 0))
    mw = pl.BlockSpec((W, W), lambda b, c: (0, 0))
    smem = pl.BlockSpec(memory_space=pltpu.MemorySpace.SMEM)
    out_shape = (jax.ShapeDtypeStruct((B, 1, H, W), jnp.float32),
                 jax.ShapeDtypeStruct((B, 1, H, W), jnp.float32))
    flops = (8 * H * W * (H + W) * B * C
             + 2 * H * W * (H + W) * B + 60 * B * H * W)
    bytes_acc = (2 * 2 * B * C * H * W                      # cnn in (bf16)
                 + 4 * 2 * B * C * H * W                    # sens (f32)
                 + 4 * 6 * B * H * W                        # t1, ti, ri (f32)
                 + 4 * 2 * B * H * W                        # out (f32)
                 + 2 * 2 * (H * H + W * W) + 4 * (H * H + W * W))
    return pl.pallas_call(
        functools.partial(reduce_update_kernel, scale=scale),
        out_shape=out_shape,
        grid=(B, C),
        in_specs=[coil_spec, coil_spec, coil_spec, coil_spec,
                  img_spec, img_spec, img_spec, img_spec, img_spec, img_spec,
                  mh, mh, mw, mw, mh, mw, smem, smem, smem],
        out_specs=(img_spec, img_spec),
        scratch_shapes=[pltpu.VMEM((H, W), jnp.float32),
                        pltpu.VMEM((H, W), jnp.float32)],
        compiler_params=pltpu.CompilerParams(
            dimension_semantics=("parallel", "arbitrary"),
            vmem_limit_bytes=48 * 1024 * 1024),
        cost_estimate=pl.CostEstimate(flops=flops, transcendentals=B * H * W,
                                      bytes_accessed=bytes_acc),
    )(cnn_re, cnn_im, s_re, s_im, t1_re, t1_im, ti_re, ti_im, ri_re, ri_im,
      fh_re, fh_ng, fw_re, fw_ng, gh, gw, vit_w, vit_b, stepsize)


def conv1x1_mlp(rk_re, rk_im, tk_re, tk_im, w1, b1, w2, b2, negative_slope=0.01):
    """Fused 1x1 conv -> LeakyReLU -> 1x1 conv on native (B, C, H*W) layout.

    Consumes the four k-space plane stacks separately (no XLA concat / transpose):
    channel order matches torch's cat([RefK_re, RefK_im, TgtK_re, TgtK_im], dim=1).
    """
    B, C, H, W = rk_re.shape
    Chid = w1.shape[0]
    Co = w2.shape[0] // 2
    N = H * W
    Np = ((N + 127) // 128) * 128           # lane-dense pixel axis
    def flat(x):
        x = x.reshape(B, C, N)
        if Np != N:
            # TODO(synk): one-time lane pad; only hit when H*W % 128 != 0.
            x = jnp.pad(x, ((0, 0), (0, 0), (0, Np - N)))
        return x
    rkr, rki, tkr, tki = flat(rk_re), flat(rk_im), flat(tk_re), flat(tk_im)
    TN = Np
    for cand in (2048, 1024, 512, 256, 128):
        if Np % cand == 0:
            TN = cand
            break
    w1b16 = w1.astype(jnp.bfloat16)
    w2b16 = w2.astype(jnp.bfloat16)
    w1a, w1b = w1b16[:, :C], w1b16[:, C:2 * C]
    w1c, w1d = w1b16[:, 2 * C:3 * C], w1b16[:, 3 * C:]
    w2r, w2i = w2b16[:Co], w2b16[Co:]
    b1c = b1.reshape(Chid, 1)
    b2r, b2i = b2[:Co].reshape(Co, 1), b2[Co:].reshape(Co, 1)

    def pix_spec(ch):
        return pl.BlockSpec((None, ch, TN), lambda b, j: (b, 0, j))

    def wspec(r, c_):
        return pl.BlockSpec((r, c_), lambda b, j: (0, 0))

    out_re, out_im = pl.pallas_call(
        functools.partial(cnn_mlp_kernel, negative_slope=negative_slope),
        out_shape=(jax.ShapeDtypeStruct((B, Co, Np), jnp.bfloat16),
                   jax.ShapeDtypeStruct((B, Co, Np), jnp.bfloat16)),
        grid=(B, Np // TN),
        in_specs=[pix_spec(C), pix_spec(C), pix_spec(C), pix_spec(C),
                  wspec(Chid, C), wspec(Chid, C), wspec(Chid, C), wspec(Chid, C),
                  wspec(Chid, 1), wspec(Co, Chid), wspec(Co, Chid),
                  wspec(Co, 1), wspec(Co, 1)],
        out_specs=(pix_spec(Co), pix_spec(Co)),
        compiler_params=pltpu.CompilerParams(
            dimension_semantics=("parallel", "parallel")),
    )(rkr, rki, tkr, tki, w1a, w1b, w1c, w1d, b1c, w2r, w2i, b2r, b2i)
    if Np != N:
        out_re = out_re[:, :, :N]
        out_im = out_im[:, :, :N]
    return out_re.reshape(B, Co, H, W), out_im.reshape(B, Co, H, W)


# ----------------------------------------------------------------------------
# DCRB module
# ----------------------------------------------------------------------------
def init_params(key):
    ks = jax.random.split(key, 4)
    p = {}
    # nn.Parameter(0.1 * torch.rand(1))
    p["stepsize"] = 0.1 * jax.random.uniform(ks[0], (1,), dtype=jnp.float32)
    # TODO(synk): CNN.NormNet (U-Net, chans=32) source unavailable; fused
    # 1x1-conv stack stand-in with matching in/out channels (8 -> 32 -> 4).
    p["cnn_w1"] = 0.1 * jax.random.normal(ks[1], (32, 8), dtype=jnp.float32)
    p["cnn_b1"] = jnp.zeros((32,), jnp.float32)
    p["cnn_w2"] = 0.1 * jax.random.normal(ks[2], (4, 32), dtype=jnp.float32)
    p["cnn_b2"] = jnp.zeros((4,), jnp.float32)
    # TODO(synk): ViT.ViT (windowed attention) source unavailable; 1x1-conv
    # stand-in mapping [target(2) ++ ref(2) ++ grad(2)] -> 2 channels.
    p["vit_w"] = 0.1 * jax.random.normal(ks[3], (2, 6), dtype=jnp.float32)
    p["vit_b"] = jnp.zeros((2,), jnp.float32)
    return p


def dcrb_forward(params, Ref_img, Ref_Kspace_f, Target_Kspace_u, Target_img_f,
                 mask, sens_maps_updated, idx=0, gate=None,
                 scale=0.1, ds_ref=True):
    del idx, gate  # unused in the torch forward as well
    # TODO(synk): only the clean ds_ref=True path is implemented (6 ViT features).
    assert ds_ref

    ti_re, ti_im = Target_img_f.real.astype(jnp.float32), Target_img_f.imag.astype(jnp.float32)
    ri_re, ri_im = Ref_img.real.astype(jnp.float32), Ref_img.imag.astype(jnp.float32)
    rk_re, rk_im = Ref_Kspace_f.real.astype(jnp.float32), Ref_Kspace_f.imag.astype(jnp.float32)
    ku_re, ku_im = Target_Kspace_u.real.astype(jnp.float32), Target_Kspace_u.imag.astype(jnp.float32)
    sm_re, sm_im = sens_maps_updated.real.astype(jnp.float32), sens_maps_updated.imag.astype(jnp.float32)
    m = mask.astype(jnp.float32)

    B, C, H, W = sm_re.shape
    fh = dft_matrices(H)            # bf16 DFT factors (re, im, -im) for the MXU
    fw = dft_matrices(W)
    gh = row_diff_matrix(H)         # f32 forward-difference matrices
    gw = col_diff_matrix(W)

    # Fused: Target_Kspace_f = sens_expand(Target_img_f, sens) [bf16 writeback];
    #        resid = mask*(mask*Kf - Ku); t1 = sens_reduce(resid, sens).
    # (the duplicated sens_expand of the torch code is a bit-identical recompute
    #  and is eliminated here — Target_Kspace_f is reused.)            [Pallas]
    tk_re, tk_im, t1_re, t1_im = expand_dc_reduce(
        ti_re, ti_im, sm_re, sm_im, ku_re, ku_im, m, fh, fw)

    # CNN stand-in (fused two-layer 1x1 conv, lane-dense, native layout,
    # consumes [RefK_re, RefK_im, TgtK_re, TgtK_im] without concat)     [Pallas]
    ocnn_re, ocnn_im = conv1x1_mlp(
        rk_re, rk_im, tk_re, tk_im,
        params["cnn_w1"], params["cnn_b1"], params["cnn_w2"], params["cnn_b2"],
        negative_slope=0.01)                                     # [B, C, H, W] x2
    assert ocnn_re.shape[1] == C

    # Fused: term2 = sens_reduce(output_CNN, sens); rss/gradient + ViT stand-in;
    # update Target_img_f - stepsize*(2*term1 + scale*term2 + scale*ViT) [Pallas]
    out_re, out_im = reduce_update(
        ocnn_re, ocnn_im, sm_re, sm_im, t1_re, t1_im, ti_re, ti_im,
        ri_re, ri_im, fh, fw, gh, gw,
        params["vit_w"], params["vit_b"], params["stepsize"], scale)
    return jax.lax.complex(out_re, out_im)


# ----------------------------------------------------------------------------
if __name__ == "__main__":
    B, COILS, H, W = 2, 2, 16, 16   # coils=2 -> 4 real channels (clean branch)
    key = jax.random.PRNGKey(0)
    kp, k1, k2, k3, k4, k5, k6 = jax.random.split(key, 7)
    params = init_params(kp)

    def crandn(k, shape):
        kr, ki = jax.random.split(k)
        return (jax.random.normal(kr, shape, jnp.float32)
                + 1j * jax.random.normal(ki, shape, jnp.float32)).astype(jnp.complex64)

    Ref_img = crandn(k1, (B, 1, H, W))
    Ref_Kspace_f = crandn(k2, (B, COILS, H, W))
    Target_Kspace_u = crandn(k3, (B, COILS, H, W))
    Target_img_f = crandn(k4, (B, 1, H, W))
    sens_maps_updated = crandn(k5, (B, COILS, H, W))
    mask = (jax.random.uniform(k6, (B, 1, H, W)) > 0.5).astype(jnp.float32)

    out = dcrb_forward(params, Ref_img, Ref_Kspace_f, Target_Kspace_u,
                       Target_img_f, mask, sens_maps_updated, idx=0, gate=None)
    out = jax.block_until_ready(out)
    assert out.shape == (B, 1, H, W)
    assert out.dtype == jnp.complex64
    print("KERNEL_OK")
</pallas_src>

<mosaic_0001>
module attributes {stable_mosaic.version = 11 : i64} {
  func.func @expand_dc_reduce_kernel(%arg0: i32, %arg1: i32, %arg2: memref<1x1x16x16xf32, #tpu.memory_space<vmem>>, %arg3: memref<1x1x16x16xf32, #tpu.memory_space<vmem>>, %arg4: memref<1x1x16x16xf32, #tpu.memory_space<vmem>>, %arg5: memref<1x1x16x16xf32, #tpu.memory_space<vmem>>, %arg6: memref<1x1x16x16xf32, #tpu.memory_space<vmem>>, %arg7: memref<1x1x16x16xf32, #tpu.memory_space<vmem>>, %arg8: memref<1x1x16x16xf32, #tpu.memory_space<vmem>>, %arg9: memref<16x16xbf16, #tpu.memory_space<vmem>>, %arg10: memref<16x16xbf16, #tpu.memory_space<vmem>>, %arg11: memref<16x16xbf16, #tpu.memory_space<vmem>>, %arg12: memref<16x16xbf16, #tpu.memory_space<vmem>>, %arg13: memref<16x16xbf16, #tpu.memory_space<vmem>>, %arg14: memref<16x16xbf16, #tpu.memory_space<vmem>>, %arg15: memref<1x1x16x16xbf16, #tpu.memory_space<vmem>>, %arg16: memref<1x1x16x16xbf16, #tpu.memory_space<vmem>>, %arg17: memref<1x1x16x16xf32, #tpu.memory_space<vmem>>, %arg18: memref<1x1x16x16xf32, #tpu.memory_space<vmem>>) attributes {dimension_semantics = [#tpu.dimension_semantics<parallel>, #tpu.dimension_semantics<arbitrary>], iteration_bounds = array<i64: 2, 2>, scalar_prefetch = 0 : i64, scratch_operands = 0 : i64, tpu.core_type = #tpu.core_type<tc>, window_params = [{transform_indices = @transform_0, window_bounds = array<i64: 1, 1, 16, 16>}, {transform_indices = @transform_1, window_bounds = array<i64: 1, 1, 16, 16>}, {transform_indices = @transform_2, window_bounds = array<i64: 1, 1, 16, 16>}, {transform_indices = @transform_3, window_bounds = array<i64: 1, 1, 16, 16>}, {transform_indices = @transform_4, window_bounds = array<i64: 1, 1, 16, 16>}, {transform_indices = @transform_5, window_bounds = array<i64: 1, 1, 16, 16>}, {transform_indices = @transform_6, window_bounds = array<i64: 1, 1, 16, 16>}, {pipeline_mode = #tpu.pipeline_mode<synchronous>, transform_indices = @transform_7, window_bounds = array<i64: 16, 16>}, {pipeline_mode = #tpu.pipeline_mode<synchronous>, transform_indices = @transform_8, window_bounds = array<i64: 16, 16>}, {pipeline_mode = #tpu.pipeline_mode<synchronous>, transform_indices = @transform_9, window_bounds = array<i64: 16, 16>}, {pipeline_mode = #tpu.pipeline_mode<synchronous>, transform_indices = @transform_10, window_bounds = array<i64: 16, 16>}, {pipeline_mode = #tpu.pipeline_mode<synchronous>, transform_indices = @transform_11, window_bounds = array<i64: 16, 16>}, {pipeline_mode = #tpu.pipeline_mode<synchronous>, transform_indices = @transform_12, window_bounds = array<i64: 16, 16>}, {transform_indices = @transform_13, window_bounds = array<i64: 1, 1, 16, 16>}, {transform_indices = @transform_14, window_bounds = array<i64: 1, 1, 16, 16>}, {transform_indices = @transform_15, window_bounds = array<i64: 1, 1, 16, 16>}, {transform_indices = @transform_16, window_bounds = array<i64: 1, 1, 16, 16>}]} {
    %c0 = arith.constant 0 : index
    %c0_0 = arith.constant 0 : index
    %c0_1 = arith.constant 0 : index
    %c0_2 = arith.constant 0 : index
    %0 = vector.load %arg2[%c0, %c0_0, %c0_1, %c0_2] : memref<1x1x16x16xf32, #tpu.memory_space<vmem>>, vector<1x1x16x16xf32>
    %1 = vector.shape_cast %0 : vector<1x1x16x16xf32> to vector<16x16xf32>
    %c0_3 = arith.constant 0 : index
    %c0_4 = arith.constant 0 : index
    %c0_5 = arith.constant 0 : index
    %c0_6 = arith.constant 0 : index
    %2 = vector.load %arg3[%c0_3, %c0_4, %c0_5, %c0_6] : memref<1x1x16x16xf32, #tpu.memory_space<vmem>>, vector<1x1x16x16xf32>
    %3 = vector.shape_cast %2 : vector<1x1x16x16xf32> to vector<16x16xf32>
    %c0_7 = arith.constant 0 : index
    %c0_8 = arith.constant 0 : index
    %c0_9 = arith.constant 0 : index
    %c0_10 = arith.constant 0 : index
    %4 = vector.load %arg4[%c0_7, %c0_8, %c0_9, %c0_10] : memref<1x1x16x16xf32, #tpu.memory_space<vmem>>, vector<1x1x16x16xf32>
    %5 = vector.shape_cast %4 : vector<1x1x16x16xf32> to vector<16x16xf32>
    %c0_11 = arith.constant 0 : index
    %c0_12 = arith.constant 0 : index
    %c0_13 = arith.constant 0 : index
    %c0_14 = arith.constant 0 : index
    %6 = vector.load %arg5[%c0_11, %c0_12, %c0_13, %c0_14] : memref<1x1x16x16xf32, #tpu.memory_space<vmem>>, vector<1x1x16x16xf32>
    %7 = vector.shape_cast %6 : vector<1x1x16x16xf32> to vector<16x16xf32>
    %c0_15 = arith.constant 0 : index
    %c0_16 = arith.constant 0 : index
    %c0_17 = arith.constant 0 : index
    %c0_18 = arith.constant 0 : index
    %8 = vector.load %arg8[%c0_15, %c0_16, %c0_17, %c0_18] : memref<1x1x16x16xf32, #tpu.memory_space<vmem>>, vector<1x1x16x16xf32>
    %9 = vector.shape_cast %8 : vector<1x1x16x16xf32> to vector<16x16xf32>
    %10 = arith.mulf %1, %5 : vector<16x16xf32>
    %11 = arith.mulf %3, %7 : vector<16x16xf32>
    %12 = arith.subf %10, %11 : vector<16x16xf32>
    %13 = arith.mulf %1, %7 : vector<16x16xf32>
    %14 = arith.mulf %3, %5 : vector<16x16xf32>
    %15 = arith.addf %13, %14 : vector<16x16xf32>
    %16 = arith.truncf %12 : vector<16x16xf32> to vector<16x16xbf16>
    %17 = arith.truncf %15 : vector<16x16xf32> to vector<16x16xbf16>
    %c0_19 = arith.constant 0 : index
    %c0_20 = arith.constant 0 : index
    %18 = vector.load %arg9[%c0_19, %c0_20] : memref<16x16xbf16, #tpu.memory_space<vmem>>, vector<16x16xbf16>
    %c0_21 = arith.constant 0 : index
    %c0_22 = arith.constant 0 : index
    %19 = vector.load %arg10[%c0_21, %c0_22] : memref<16x16xbf16, #tpu.memory_space<vmem>>, vector<16x16xbf16>
    %c0_23 = arith.constant 0 : index
    %c0_24 = arith.constant 0 : index
    %20 = vector.load %arg12[%c0_23, %c0_24] : memref<16x16xbf16, #tpu.memory_space<vmem>>, vector<16x16xbf16>
    %c0_25 = arith.constant 0 : index
    %c0_26 = arith.constant 0 : index
    %21 = vector.load %arg13[%c0_25, %c0_26] : memref<16x16xbf16, #tpu.memory_space<vmem>>, vector<16x16xbf16>
    %cst = arith.constant dense<0.000000e+00> : vector<16x16xf32>
    %22 = tpu.matmul %18, %16, %cst {dimension_numbers = #tpu.dot_dimension_numbers<[1], [0], [0], [1], [0, 0, 1, 1], [], []>} : vector<16x16xbf16>, vector<16x16xbf16>, vector<16x16xf32> -> vector<16x16xf32>
    %cst_27 = arith.constant dense<0.000000e+00> : vector<16x16xf32>
    %23 = tpu.matmul %19, %17, %cst_27 {dimension_numbers = #tpu.dot_dimension_numbers<[1], [0], [0], [1], [0, 0, 1, 1], [], []>} : vector<16x16xbf16>, vector<16x16xbf16>, vector<16x16xf32> -> vector<16x16xf32>
    %24 = arith.subf %22, %23 : vector<16x16xf32>
    %cst_28 = arith.constant dense<0.000000e+00> : vector<16x16xf32>
    %25 = tpu.matmul %18, %17, %cst_28 {dimension_numbers = #tpu.dot_dimension_numbers<[1], [0], [0], [1], [0, 0, 1, 1], [], []>} : vector<16x16xbf16>, vector<16x16xbf16>, vector<16x16xf32> -> vector<16x16xf32>
    %cst_29 = arith.constant dense<0.000000e+00> : vector<16x16xf32>
    %26 = tpu.matmul %19, %16, %cst_29 {dimension_numbers = #tpu.dot_dimension_numbers<[1], [0], [0], [1], [0, 0, 1, 1], [], []>} : vector<16x16xbf16>, vector<16x16xbf16>, vector<16x16xf32> -> vector<16x16xf32>
    %27 = arith.addf %25, %26 : vector<16x16xf32>
    %28 = arith.truncf %24 : vector<16x16xf32> to vector<16x16xbf16>
    %29 = arith.truncf %27 : vector<16x16xf32> to vector<16x16xbf16>
    %cst_30 = arith.constant dense<0.000000e+00> : vector<16x16xf32>
    %30 = tpu.matmul %28, %20, %cst_30 {dimension_numbers = #tpu.dot_dimension_numbers<[1], [0], [0], [1], [0, 0, 1, 1], [], []>} : vector<16x16xbf16>, vector<16x16xbf16>, vector<16x16xf32> -> vector<16x16xf32>
    %cst_31 = arith.constant dense<0.000000e+00> : vector<16x16xf32>
    %31 = tpu.matmul %29, %21, %cst_31 {dimension_numbers = #tpu.dot_dimension_numbers<[1], [0], [0], [1], [0, 0, 1, 1], [], []>} : vector<16x16xbf16>, vector<16x16xbf16>, vector<16x16xf32> -> vector<16x16xf32>
    %32 = arith.subf %30, %31 : vector<16x16xf32>
    %cst_32 = arith.constant dense<0.000000e+00> : vector<16x16xf32>
    %33 = tpu.matmul %28, %21, %cst_32 {dimension_numbers = #tpu.dot_dimension_numbers<[1], [0], [0], [1], [0, 0, 1, 1], [], []>} : vector<16x16xbf16>, vector<16x16xbf16>, vector<16x16xf32> -> vector<16x16xf32>
    %cst_33 = arith.constant dense<0.000000e+00> : vector<16x16xf32>
    %34 = tpu.matmul %29, %20, %cst_33 {dimension_numbers = #tpu.dot_dimension_numbers<[1], [0], [0], [1], [0, 0, 1, 1], [], []>} : vector<16x16xbf16>, vector<16x16xbf16>, vector<16x16xf32> -> vector<16x16xf32>
    %35 = arith.addf %33, %34 : vector<16x16xf32>
    %36 = arith.truncf %32 : vector<16x16xf32> to vector<16x16xbf16>
    %c0_34 = arith.constant 0 : index
    %c0_35 = arith.constant 0 : index
    %c0_36 = arith.constant 0 : index
    %c0_37 = arith.constant 0 : index
    %37 = vector.load %arg15[%c0_34, %c0_35, %c0_36, %c0_37] : memref<1x1x16x16xbf16, #tpu.memory_space<vmem>>, vector<1x1x16x16xbf16>
    %38 = vector.shape_cast %37 : vector<1x1x16x16xbf16> to vector<16x16xbf16>
    %39 = vector.shape_cast %36 : vector<16x16xbf16> to vector<1x1x16x16xbf16>
    tpu.vector_store %arg15[%c0_34, %c0_35, %c0_36, %c0_37], %39 {strides = array<i32>} : memref<1x1x16x16xbf16, #tpu.memory_space<vmem>>, vector<1x1x16x16xbf16>,
    %40 = arith.truncf %35 : vector<16x16xf32> to vector<16x16xbf16>
    %c0_38 = arith.constant 0 : index
    %c0_39 = arith.constant 0 : index
    %c0_40 = arith.constant 0 : index
    %c0_41 = arith.constant 0 : index
    %41 = vector.load %arg16[%c0_38, %c0_39, %c0_40, %c0_41] : memref<1x1x16x16xbf16, #tpu.memory_space<vmem>>, vector<1x1x16x16xbf16>
    %42 = vector.shape_cast %41 : vector<1x1x16x16xbf16> to vector<16x16xbf16>
    %43 = vector.shape_cast %40 : vector<16x16xbf16> to vector<1x1x16x16xbf16>
    tpu.vector_store %arg16[%c0_38, %c0_39, %c0_40, %c0_41], %43 {strides = array<i32>} : memref<1x1x16x16xbf16, #tpu.memory_space<vmem>>, vector<1x1x16x16xbf16>,
    %44 = arith.mulf %9, %32 : vector<16x16xf32>
    %c0_42 = arith.constant 0 : index
    %c0_43 = arith.constant 0 : index
    %c0_44 = arith.constant 0 : index
    %c0_45 = arith.constant 0 : index
    %45 = vector.load %arg6[%c0_42, %c0_43, %c0_44, %c0_45] : memref<1x1x16x16xf32, #tpu.memory_space<vmem>>, vector<1x1x16x16xf32>
    %46 = vector.shape_cast %45 : vector<1x1x16x16xf32> to vector<16x16xf32>
    %47 = arith.subf %44, %46 : vector<16x16xf32>
    %48 = arith.mulf %9, %47 : vector<16x16xf32>
    %49 = arith.mulf %9, %35 : vector<16x16xf32>
    %c0_46 = arith.constant 0 : index
    %c0_47 = arith.constant 0 : index
    %c0_48 = arith.constant 0 : index
    %c0_49 = arith.constant 0 : index
    %50 = vector.load %arg7[%c0_46, %c0_47, %c0_48, %c0_49] : memref<1x1x16x16xf32, #tpu.memory_space<vmem>>, vector<1x1x16x16xf32>
    %51 = vector.shape_cast %50 : vector<1x1x16x16xf32> to vector<16x16xf32>
    %52 = arith.subf %49, %51 : vector<16x16xf32>
    %53 = arith.mulf %9, %52 : vector<16x16xf32>
    %54 = arith.truncf %48 : vector<16x16xf32> to vector<16x16xbf16>
    %55 = arith.truncf %53 : vector<16x16xf32> to vector<16x16xbf16>
    %c0_50 = arith.constant 0 : index
    %c0_51 = arith.constant 0 : index
    %56 = vector.load %arg9[%c0_50, %c0_51] : memref<16x16xbf16, #tpu.memory_space<vmem>>, vector<16x16xbf16>
    %c0_52 = arith.constant 0 : index
    %c0_53 = arith.constant 0 : index
    %57 = vector.load %arg11[%c0_52, %c0_53] : memref<16x16xbf16, #tpu.memory_space<vmem>>, vector<16x16xbf16>
    %c0_54 = arith.constant 0 : index
    %c0_55 = arith.constant 0 : index
    %58 = vector.load %arg12[%c0_54, %c0_55] : memref<16x16xbf16, #tpu.memory_space<vmem>>, vector<16x16xbf16>
    %c0_56 = arith.constant 0 : index
    %c0_57 = arith.constant 0 : index
    %59 = vector.load %arg14[%c0_56, %c0_57] : memref<16x16xbf16, #tpu.memory_space<vmem>>, vector<16x16xbf16>
    %cst_58 = arith.constant dense<0.000000e+00> : vector<16x16xf32>
    %60 = tpu.matmul %56, %54, %cst_58 {dimension_numbers = #tpu.dot_dimension_numbers<[1], [0], [0], [1], [0, 0, 1, 1], [], []>} : vector<16x16xbf16>, vector<16x16xbf16>, vector<16x16xf32> -> vector<16x16xf32>
    %cst_59 = arith.constant dense<0.000000e+00> : vector<16x16xf32>
    %61 = tpu.matmul %57, %55, %cst_59 {dimension_numbers = #tpu.dot_dimension_numbers<[1], [0], [0], [1], [0, 0, 1, 1], [], []>} : vector<16x16xbf16>, vector<16x16xbf16>, vector<16x16xf32> -> vector<16x16xf32>
    %62 = arith.subf %60, %61 : vector<16x16xf32>
    %cst_60 = arith.constant dense<0.000000e+00> : vector<16x16xf32>
    %63 = tpu.matmul %56, %55, %cst_60 {dimension_numbers = #tpu.dot_dimension_numbers<[1], [0], [0], [1], [0, 0, 1, 1], [], []>} : vector<16x16xbf16>, vector<16x16xbf16>, vector<16x16xf32> -> vector<16x16xf32>
    %cst_61 = arith.constant dense<0.000000e+00> : vector<16x16xf32>
    %64 = tpu.matmul %57, %54, %cst_61 {dimension_numbers = #tpu.dot_dimension_numbers<[1], [0], [0], [1], [0, 0, 1, 1], [], []>} : vector<16x16xbf16>, vector<16x16xbf16>, vector<16x16xf32> -> vector<16x16xf32>
    %65 = arith.addf %63, %64 : vector<16x16xf32>
    %66 = arith.truncf %62 : vector<16x16xf32> to vector<16x16xbf16>
    %67 = arith.truncf %65 : vector<16x16xf32> to vector<16x16xbf16>
    %cst_62 = arith.constant dense<0.000000e+00> : vector<16x16xf32>
    %68 = tpu.matmul %66, %58, %cst_62 {dimension_numbers = #tpu.dot_dimension_numbers<[1], [0], [0], [1], [0, 0, 1, 1], [], []>} : vector<16x16xbf16>, vector<16x16xbf16>, vector<16x16xf32> -> vector<16x16xf32>
    %cst_63 = arith.constant dense<0.000000e+00> : vector<16x16xf32>
    %69 = tpu.matmul %67, %59, %cst_63 {dimension_numbers = #tpu.dot_dimension_numbers<[1], [0], [0], [1], [0, 0, 1, 1], [], []>} : vector<16x16xbf16>, vector<16x16xbf16>, vector<16x16xf32> -> vector<16x16xf32>
    %70 = arith.subf %68, %69 : vector<16x16xf32>
    %cst_64 = arith.constant dense<0.000000e+00> : vector<16x16xf32>
    %71 = tpu.matmul %66, %59, %cst_64 {dimension_numbers = #tpu.dot_dimension_numbers<[1], [0], [0], [1], [0, 0, 1, 1], [], []>} : vector<16x16xbf16>, vector<16x16xbf16>, vector<16x16xf32> -> vector<16x16xf32>
    %cst_65 = arith.constant dense<0.000000e+00> : vector<16x16xf32>
    %72 = tpu.matmul %67, %58, %cst_65 {dimension_numbers = #tpu.dot_dimension_numbers<[1], [0], [0], [1], [0, 0, 1, 1], [], []>} : vector<16x16xbf16>, vector<16x16xbf16>, vector<16x16xf32> -> vector<16x16xf32>
    %73 = arith.addf %71, %72 : vector<16x16xf32>
    %74 = arith.mulf %5, %70 : vector<16x16xf32>
    %75 = arith.mulf %7, %73 : vector<16x16xf32>
    %76 = arith.addf %74, %75 : vector<16x16xf32>
    %77 = arith.mulf %5, %73 : vector<16x16xf32>
    %78 = arith.mulf %7, %70 : vector<16x16xf32>
    %79 = arith.subf %77, %78 : vector<16x16xf32>
    %c0_i32 = arith.constant 0 : i32
    %80 = arith.cmpi eq, %arg1, %c0_i32 : i32
    %81 = arith.extui %80 : i1 to i32
    %c0_i32_66 = arith.constant 0 : i32
    %82 = arith.cmpi ne, %81, %c0_i32_66 : i32
    scf.if %82 {
      %c0_69 = arith.constant 0 : index
      %c0_70 = arith.constant 0 : index
      %c0_71 = arith.constant 0 : index
      %c0_72 = arith.constant 0 : index
      %86 = vector.load %arg17[%c0_69, %c0_70, %c0_71, %c0_72] : memref<1x1x16x16xf32, #tpu.memory_space<vmem>>, vector<1x1x16x16xf32>
      %87 = vector.shape_cast %86 : vector<1x1x16x16xf32> to vector<16x16xf32>
      %88 = vector.shape_cast %76 : vector<16x16xf32> to vector<1x1x16x16xf32>
      tpu.vector_store %arg17[%c0_69, %c0_70, %c0_71, %c0_72], %88 {strides = array<i32>} : memref<1x1x16x16xf32, #tpu.memory_space<vmem>>, vector<1x1x16x16xf32>,
      %c0_73 = arith.constant 0 : index
      %c0_74 = arith.constant 0 : index
      %c0_75 = arith.constant 0 : index
      %c0_76 = arith.constant 0 : index
      %89 = vector.load %arg18[%c0_73, %c0_74, %c0_75, %c0_76] : memref<1x1x16x16xf32, #tpu.memory_space<vmem>>, vector<1x1x16x16xf32>
      %90 = vector.shape_cast %89 : vector<1x1x16x16xf32> to vector<16x16xf32>
      %91 = vector.shape_cast %79 : vector<16x16xf32> to vector<1x1x16x16xf32>
      tpu.vector_store %arg18[%c0_73, %c0_74, %c0_75, %c0_76], %91 {strides = array<i32>} : memref<1x1x16x16xf32, #tpu.memory_space<vmem>>, vector<1x1x16x16xf32>,
    } else {
    }
    %c0_i32_67 = arith.constant 0 : i32
    %83 = arith.cmpi sgt, %arg1, %c0_i32_67 : i32
    %84 = arith.extui %83 : i1 to i32
    %c0_i32_68 = arith.constant 0 : i32
    %85 = arith.cmpi ne, %84, %c0_i32_68 : i32
    scf.if %85 {
      %c0_69 = arith.constant 0 : index
      %c0_70 = arith.constant 0 : index
      %c0_71 = arith.constant 0 : index
      %c0_72 = arith.constant 0 : index
      %86 = vector.load %arg17[%c0_69, %c0_70, %c0_71, %c0_72] : memref<1x1x16x16xf32, #tpu.memory_space<vmem>>, vector<1x1x16x16xf32>
      %87 = vector.shape_cast %86 : vector<1x1x16x16xf32> to vector<16x16xf32>
      %88 = arith.addf %87, %76 : vector<16x16xf32>
      %c0_73 = arith.constant 0 : index
      %c0_74 = arith.constant 0 : index
      %c0_75 = arith.constant 0 : index
      %c0_76 = arith.constant 0 : index
      %89 = vector.load %arg17[%c0_73, %c0_74, %c0_75, %c0_76] : memref<1x1x16x16xf32, #tpu.memory_space<vmem>>, vector<1x1x16x16xf32>
      %90 = vector.shape_cast %89 : vector<1x1x16x16xf32> to vector<16x16xf32>
      %91 = vector.shape_cast %88 : vector<16x16xf32> to vector<1x1x16x16xf32>
      tpu.vector_store %arg17[%c0_73, %c0_74, %c0_75, %c0_76], %91 {strides = array<i32>} : memref<1x1x16x16xf32, #tpu.memory_space<vmem>>, vector<1x1x16x16xf32>,
      %c0_77 = arith.constant 0 : index
      %c0_78 = arith.constant 0 : index
      %c0_79 = arith.constant 0 : index
      %c0_80 = arith.constant 0 : index
      %92 = vector.load %arg18[%c0_77, %c0_78, %c0_79, %c0_80] : memref<1x1x16x16xf32, #tpu.memory_space<vmem>>, vector<1x1x16x16xf32>
      %93 = vector.shape_cast %92 : vector<1x1x16x16xf32> to vector<16x16xf32>
      %94 = arith.addf %93, %79 : vector<16x16xf32>
      %c0_81 = arith.constant 0 : index
      %c0_82 = arith.constant 0 : index
      %c0_83 = arith.constant 0 : index
      %c0_84 = arith.constant 0 : index
      %95 = vector.load %arg18[%c0_81, %c0_82, %c0_83, %c0_84] : memref<1x1x16x16xf32, #tpu.memory_space<vmem>>, vector<1x1x16x16xf32>
      %96 = vector.shape_cast %95 : vector<1x1x16x16xf32> to vector<16x16xf32>
      %97 = vector.shape_cast %94 : vector<16x16xf32> to vector<1x1x16x16xf32>
      tpu.vector_store %arg18[%c0_81, %c0_82, %c0_83, %c0_84], %97 {strides = array<i32>} : memref<1x1x16x16xf32, #tpu.memory_space<vmem>>, vector<1x1x16x16xf32>,
    } else {
    }
    return
  }
  func.func @transform_0(%arg0: i32, %arg1: i32) -> (i32, i32, i32, i32) {
    %c0_i32 = arith.constant 0 : i32
    %c0_i32_0 = arith.constant 0 : i32
    %c0_i32_1 = arith.constant 0 : i32
    %c0_i32_2 = arith.constant 0 : i32
    return %arg0, %c0_i32, %c0_i32_0, %c0_i32_1 : i32, i32, i32, i32
  }
  func.func @transform_1(%arg0: i32, %arg1: i32) -> (i32, i32, i32, i32) {
    %c0_i32 = arith.constant 0 : i32
    %c0_i32_0 = arith.constant 0 : i32
    %c0_i32_1 = arith.constant 0 : i32
    %c0_i32_2 = arith.constant 0 : i32
    return %arg0, %c0_i32, %c0_i32_0, %c0_i32_1 : i32, i32, i32, i32
  }
  func.func @transform_2(%arg0: i32, %arg1: i32) -> (i32, i32, i32, i32) {
    %c0_i32 = arith.constant 0 : i32
    %c0_i32_0 = arith.constant 0 : i32
    %c0_i32_1 = arith.constant 0 : i32
    return %arg0, %arg1, %c0_i32, %c0_i32_0 : i32, i32, i32, i32
  }
  func.func @transform_3(%arg0: i32, %arg1: i32) -> (i32, i32, i32, i32) {
    %c0_i32 = arith.constant 0 : i32
    %c0_i32_0 = arith.constant 0 : i32
    %c0_i32_1 = arith.constant 0 : i32
    return %arg0, %arg1, %c0_i32, %c0_i32_0 : i32, i32, i32, i32
  }
  func.func @transform_4(%arg0: i32, %arg1: i32) -> (i32, i32, i32, i32) {
    %c0_i32 = arith.constant 0 : i32
    %c0_i32_0 = arith.constant 0 : i32
    %c0_i32_1 = arith.constant 0 : i32
    return %arg0, %arg1, %c0_i32, %c0_i32_0 : i32, i32, i32, i32
  }
  func.func @transform_5(%arg0: i32, %arg1: i32) -> (i32, i32, i32, i32) {
    %c0_i32 = arith.constant 0 : i32
    %c0_i32_0 = arith.constant 0 : i32
    %c0_i32_1 = arith.constant 0 : i32
    return %arg0, %arg1, %c0_i32, %c0_i32_0 : i32, i32, i32, i32
  }
  func.func @transform_6(%arg0: i32, %arg1: i32) -> (i32, i32, i32, i32) {
    %c0_i32 = arith.constant 0 : i32
    %c0_i32_0 = arith.constant 0 : i32
    %c0_i32_1 = arith.constant 0 : i32
    %c0_i32_2 = arith.constant 0 : i32
    return %arg0, %c0_i32, %c0_i32_0, %c0_i32_1 : i32, i32, i32, i32
  }
  func.func @transform_7(%arg0: i32, %arg1: i32) -> (i32, i32) {
    %c0_i32 = arith.constant 0 : i32
    %c0_i32_0 = arith.constant 0 : i32
    %c0_i32_1 = arith.constant 0 : i32
    return %c0_i32, %c0_i32_0 : i32, i32
  }
  func.func @transform_8(%arg0: i32, %arg1: i32) -> (i32, i32) {
    %c0_i32 = arith.constant 0 : i32
    %c0_i32_0 = arith.constant 0 : i32
    %c0_i32_1 = arith.constant 0 : i32
    return %c0_i32, %c0_i32_0 : i32, i32
  }
  func.func @transform_9(%arg0: i32, %arg1: i32) -> (i32, i32) {
    %c0_i32 = arith.constant 0 : i32
    %c0_i32_0 = arith.constant 0 : i32
    %c0_i32_1 = arith.constant 0 : i32
    return %c0_i32, %c0_i32_0 : i32, i32
  }
  func.func @transform_10(%arg0: i32, %arg1: i32) -> (i32, i32) {
    %c0_i32 = arith.constant 0 : i32
    %c0_i32_0 = arith.constant 0 : i32
    %c0_i32_1 = arith.constant 0 : i32
    return %c0_i32, %c0_i32_0 : i32, i32
  }
  func.func @transform_11(%arg0: i32, %arg1: i32) -> (i32, i32) {
    %c0_i32 = arith.constant 0 : i32
    %c0_i32_0 = arith.constant 0 : i32
    %c0_i32_1 = arith.constant 0 : i32
    return %c0_i32, %c0_i32_0 : i32, i32
  }
  func.func @transform_12(%arg0: i32, %arg1: i32) -> (i32, i32) {
    %c0_i32 = arith.constant 0 : i32
    %c0_i32_0 = arith.constant 0 : i32
    %c0_i32_1 = arith.constant 0 : i32
    return %c0_i32, %c0_i32_0 : i32, i32
  }
  func.func @transform_13(%arg0: i32, %arg1: i32) -> (i32, i32, i32, i32) {
    %c0_i32 = arith.constant 0 : i32
    %c0_i32_0 = arith.constant 0 : i32
    %c0_i32_1 = arith.constant 0 : i32
    return %arg0, %arg1, %c0_i32, %c0_i32_0 : i32, i32, i32, i32
  }
  func.func @transform_14(%arg0: i32, %arg1: i32) -> (i32, i32, i32, i32) {
    %c0_i32 = arith.constant 0 : i32
    %c0_i32_0 = arith.constant 0 : i32
    %c0_i32_1 = arith.constant 0 : i32
    return %arg0, %arg1, %c0_i32, %c0_i32_0 : i32, i32, i32, i32
  }
  func.func @transform_15(%arg0: i32, %arg1: i32) -> (i32, i32, i32, i32) {
    %c0_i32 = arith.constant 0 : i32
    %c0_i32_0 = arith.constant 0 : i32
    %c0_i32_1 = arith.constant 0 : i32
    %c0_i32_2 = arith.constant 0 : i32
    return %arg0, %c0_i32, %c0_i32_0, %c0_i32_1 : i32, i32, i32, i32
  }
  func.func @transform_16(%arg0: i32, %arg1: i32) -> (i32, i32, i32, i32) {
    %c0_i32 = arith.constant 0 : i32
    %c0_i32_0 = arith.constant 0 : i32
    %c0_i32_1 = arith.constant 0 : i32
    %c0_i32_2 = arith.constant 0 : i32
    return %arg0, %c0_i32, %c0_i32_0, %c0_i32_1 : i32, i32, i32, i32
  }
}

</mosaic_0001>

<bundles_post_ra>
// kernel: tpu_custom_call.1
= control target key start
LH: loop header
LB: loop body
LE: loop exit
PB: predicated region body
PF: predicated region fallthrough
CT: control target
= control target key end

     0   :  { %s4031_s0 = inlined_call_operand.hbm [shape: f32[2,1,16,16], index: 0, kind: input, shape index: {}]   ;;  %s4032_s1 = inlined_call_operand.hbm [shape: f32[2,1,16,16], index: 1, kind: input, shape index: {}]   ;;  %s4033_s2 = inlined_call_operand.hbm [shape: f32[2,2,16,16], index: 2, kind: input, shape index: {}]   ;;  %s4034_s3 = inlined_call_operand.hbm [shape: f32[2,2,16,16], index: 3, kind: input, shape index: {}]   ;;  %s4035_s4 = inlined_call_operand.hbm [shape: f32[2,2,16,16], index: 4, kind: input, shape index: {}]   ;;  %s4036_s5 = inlined_call_operand.hbm [shape: f32[2,2,16,16], index: 5, kind: input, shape index: {}]   ;;  %s4037_s6 = inlined_call_operand.hbm [shape: f32[2,1,16,16], index: 6, kind: input, shape index: {}]   ;;  %s4038_s7 = inlined_call_operand.vmem [shape: bf16[16,16], index: 7, kind: input, shape index: {}]   ;;  %s4039_s8 = inlined_call_operand.hbm [shape: bf16[16,16], index: 8, kind: input, shape index: {}]   ;;  %s4040_s9 = inlined_call_operand.vmem [shape: bf16[16,16], index: 9, kind: input, shape index: {}]   ;;  %s4041_s10 = inlined_call_operand.hbm [shape: bf16[16,16], index: 10, kind: input, shape index: {}]   ;;  %s4042_s11 = inlined_call_operand.hbm [shape: bf16[16,16], index: 11, kind: input, shape index: {}]   ;;  %s4043_s12 = inlined_call_operand.hbm [shape: bf16[16,16], index: 12, kind: input, shape index: {}]   ;;  %s4044_s13 = inlined_call_operand.hbm [shape: bf16[2,2,16,16], index: 13, kind: output, shape index: {0}]   ;;  %s4045_s14 = inlined_call_operand.hbm [shape: bf16[2,2,16,16], index: 14, kind: output, shape index: {1}]   ;;  %s4046_s15 = inlined_call_operand.hbm [shape: f32[2,1,16,16], index: 15, kind: output, shape index: {2}]   ;;  %s4047_s16 = inlined_call_operand.hbm [shape: f32[2,1,16,16], index: 16, kind: output, shape index: {3}]  }
   0x1   :  { %4106 = sst [smem:[#allocation57_spill]] %s4031_s0 }
   0x2   :  { %4107 = sst [smem:[#allocation58_spill]] %s4032_s1 }
   0x3   :  { %4108 = sst [smem:[#allocation59_spill]] %s4033_s2 }
   0x4   :  { %4109 = sst [smem:[#allocation60_spill]] %s4034_s3 }
   0x5   :  { %4110 = sst [smem:[#allocation61_spill]] %s4035_s4 }
   0x6   :  { %4111 = sst [smem:[#allocation62_spill]] %s4036_s5 }
   0x7   :  { %4112 = sst [smem:[#allocation63_spill]] %s4037_s6 }
   0x8   :  { %4113 = sst [smem:[#allocation64_spill]] %s4038_s7 }
   0x9   :  { %4114 = sst [smem:[#allocation65_spill]] %s4039_s8 }
   0xa   :  { %4115 = sst [smem:[#allocation66_spill]] %s4040_s9 }
   0xb   :  { %4116 = sst [smem:[#allocation67_spill]] %s4041_s10 }
   0xc   :  { %4117 = sst [smem:[#allocation68_spill]] %s4042_s11 }
   0xd   :  { %4118 = sst [smem:[#allocation69_spill]] %s4043_s12 }
   0xe   :  { %4119 = sst [smem:[#allocation70_spill]] %s4044_s13 }
   0xf   :  { %4120 = sst [smem:[#allocation71_spill]] %s4045_s14 }
  0x10   :  { %4121 = sst [smem:[#allocation72_spill]] %s4046_s15 }
  0x11   :  { %4122 = sst [smem:[#allocation73_spill]] %s4047_s16 }
  0x12   :  { %22 = vsyncpa [#allocation3], 0 }
  0x13   :  { %24 = vsyncpa [#allocation3 + $0x1], 0 }
  0x14   :  { %25 = vsyncpa [#allocation6], 0 }
  0x15   :  { %27 = vsyncpa [#allocation6 + $0x1], 0 }
  0x16   :  { %28 = vsyncpa [#allocation9], 0 }
  0x17   :  { %30 = vsyncpa [#allocation9 + $0x1], 0 }
  0x18   :  { %31 = vsyncpa [#allocation12], 0 }
  0x19   :  { %33 = vsyncpa [#allocation12 + $0x1], 0 }
  0x1a   :  { %34 = vsyncpa [#allocation15], 0 }
  0x1b   :  { %35 = vsyncpa [#allocation18], 0 }
  0x1c   :  { %36 = vsyncpa [#allocation4], 0 }
  0x1d   :  { %38 = vsyncpa [#allocation4 + $0x1], 0 }
  0x1e   :  { %39 = vsyncpa [#allocation22], 0 }
  0x1f   :  { %41 = vsyncpa [#allocation22 + $0x1], 0 }
  0x20   :  { %42 = vsyncpa [#allocation25], 0 }
  0x21   :  { %44 = vsyncpa [#allocation25 + $0x1], 0  ;;  %s3273_s21 = smov 0   ;;  %s3275_s22 = smov 0  }
  0x22   :  { %s3277_s23 = smov 0   ;;  %s3279_s24 = smov 0  }
  0x23   :  { %s3281_s25 = smov 0   ;;  %s3283_s26 = smov 0  }
  0x24   :  { %s3285_s27 = smov 0   ;;  %s3287_s28 = smov 0  }
  0x25   :  { %s3289_s29 = smov 0   ;;  %s3291_s30 = smov 0  }
  0x26   :  { %s3293_s0 = smov 0  }
  0x27 LB: > { %4123 = sst [smem:[#allocation38_spill]] %s3121_s21  ;;  %s3329_s17 = sadd.s32 4294967295, %s3161_s0   ;;  %s3161_s0 = sphi %s3293_s0, %s4231_s0   ;;  %s3157_s30 = sphi %s3291_s30, %s4230_s30   ;;  %s3153_s29 = sphi %s3289_s29, %s4229_s29   ;;  %s3149_s28 = sphi %s3287_s28, %s4222_s28   ;;  %s3145_s27 = sphi %s3285_s27, %s4221_s27   ;;  %s3141_s26 = sphi %s3283_s26, %s4228_s26   ;;  %s3137_s25 = sphi %s3281_s25, %s4227_s25   ;;  %s3133_s24 = sphi %s3279_s24, %s4219_s24   ;;  %s3129_s23 = sphi %s3277_s23, %s4226_s23   ;;  %s3125_s22 = sphi %s3275_s22, %s4225_s22   ;;  %s3121_s21 = sphi %s3273_s21, %s4218_s21  }
  0x28   : > { %4124 = sst [smem:[#allocation39_spill]] %s3125_s22  ;;  %s4051_s18 = sadd.s32 4294967294, %s3161_s0  }
  0x29   : > { %4125 = sst [smem:[#allocation40_spill]] %s3133_s24  ;;  %p82_p0 = scmp.ne.s32.totalorder %s3137_s25, %s3133_s24 }
  0x2a   : > { %4126 = sst [smem:[#allocation41_spill]] %s3137_s25  ;;  %p4066_p1 = scmp.eq.s32.totalorder %s3329_s17, 0 }
  0x2b   : > { %4127 = sst [smem:[#allocation42_spill]] %s3145_s27  ;;  %p136_p2 = scmp.ne.s32.totalorder %s3125_s22, %s3121_s21 }
  0x2c   : > { %4128 = sst [smem:[#allocation43_spill]] %s3149_s28  ;;  %p3340_p4 = por %p4066_p1, %p82_p0 }
  0x2d   : > { %4129 = sst [smem:[#allocation44_spill]] %s3153_s29  ;;  %p404_p5 = scmp.eq.s32.totalorder %s4051_s18, 3 }
  0x2e   : > { %4130 = sst [smem:[#allocation45_spill]] %s3157_s30  ;;  %p3348_p6 = por %p136_p2, %p4066_p1 }
  0x2f   : > { %4131 = sst [smem:[#allocation46_spill]] %s3161_s0  ;;  %p2187_p7 = scmp.ge.s32.totalorder %s3161_s0, 1 }
  0x30   : > { %4132 = sst [smem:[#allocation47_spill]] %s3329_s17  ;;  %p3353_p8 = por %p404_p5, %p136_p2 }
  0x31   : > { %s4133_s19 = scalar_select %p3340_p4, 1, 0 }
  0x32   : > { %s4135_s20 = scalar_select %p3348_p6, 1, 0 }
  0x33   : > { %4134 = sst [smem:[#allocation48_spill]] %s4133_s19  ;;  %p3357_p9 = por %p404_p5, %p82_p0 }
  0x34   : > { %4136 = sst [smem:[#allocation49_spill]] %s4135_s20  ;;  %p491_p10 = scmp.lt.s32.totalorder %s3161_s0, 5 }
  0x35   : > { %s4137_s16 = scalar_select %p3353_p8, 1, 0 }
  0x36   : > { %s4139_s24 = scalar_select %p3357_p9, 1, 0 }
  0x37   : > { %4138 = sst [smem:[#allocation50_spill]] %s4137_s16  ;;  %p3362_p11 = pnand %p2187_p7, %p491_p10 }
  0x38   : > { %4140 = sst [smem:[#allocation51_spill]] %s4139_s24  ;;  %s3163_s18 = smov [#allocation14]  }
  0x39   : > { %s4141_s21 = scalar_select %p3362_p11, 1, 0 }
  0x3a   : > { %s506_s15 = sshll.u32 %s3163_s18, 4  ;;  %p2455_p12 = pneg %p3362_p11  ;;  %s507_s15 = int_to_ptr.vmem [resolvable:$true] %s506_s15 }
  0x3b   : > { %4142 = sst [smem:[#allocation52_spill]] %s4141_s21  ;;  %s3164_s16 = smov [#allocation17]  }
  0x3c   : > { %p3370_p13 = pnand %p2455_p12, %p4066_p1  ;;  %s535_s24 = sshll.u32 %s3164_s16, 4  ;;  %s536_s24 = int_to_ptr.vmem [resolvable:$true] %s535_s24 }
  0x3d   : > { %s2634_s14 = scalar_lea.vmem %s507_s15, 128  ;;  %p2642_p10 = scmp.lt.s32.totalorder %s507_s15, %s507_s15 }
  0x3e   : > { %p4072_p0 = pneg %p3370_p13  ;;  %p2635_p2 = scmp.ne.s32.totalorder %s507_s15, %s2634_s14 }
  0x3f   : > { %p2643_p3 = scmp.lt.s32.totalorder %s2634_s14, %s2634_s14 }
  0x40   : > { %p2637_p5 = pnand %p2635_p2, %p4072_p0 }
  0x41   : > { %p2644_p9 = por %p2643_p3, %p2642_p10 }
  0x42   : > { %p2638_p7 = pneg %p2637_p5 }
  0x44   : > { %p2645_p12 = pnand %p2644_p9, %p2638_p7 }
  0x46   : > { %2648 = shalt.err (!%p2645_p12)
}
  0x47   : > { %s4059_s18 = smov 64   ;;  %s4061_s28 = smov 4  }
  0x48   : > { %s4144_s8 = sld [smem:[#allocation65_spill]]  ;;  %s2660_s9 = scalar_lea.vmem %s536_s24, 128 }
  0x49   : > { %p2661_p2 = scmp.ne.s32.totalorder %s536_s24, %s2660_s9  ;;  %p2668_p9 = scmp.lt.s32.totalorder %s536_s24, %s536_s24 }
  0x4a   : > { %p2669_p7 = scmp.lt.s32.totalorder %s2660_s9, %s2660_s9 }
  0x4b   : > { %p2663_p5 = pnand %p2661_p2, %p4072_p0 }
  0x4c   : > { %p2670_p10 = por %p2669_p7, %p2668_p9 }
  0x4d   : > { %p2664_p3 = pneg %p2663_p5 }
  0x4e   : > { %2458 = dma.hbm_to_vmem [thread:$0]  (!%p3370_p13), %s4144_s8, 128, %s507_s15, [#allocation15], %s4059_s18, %s4059_s18, %s4061_s28  }
  0x4f   : > { %p2671_p12 = pnand %p2670_p10, %p2664_p3 }
  0x51   : > { %2674 = shalt.err (!%p2671_p12)
}
  0x52   : > { %s4145_s11 = sld [smem:[#allocation68_spill]]  ;;  %p76_p2 = scmp.ne.s32.totalorder %s3141_s26, %s3137_s25 }
  0x53   : > { %p4074_p5 = scmp.eq.s32.totalorder %s3161_s0, 0  ;;  %p4073_p3 = scmp.lt.s32.totalorder %s3161_s0, 4 }
  0x54   : > { %p4146_p9 = scmp.eq.s32.totalorder %s3329_s17, 3  ;;  %s4063_s27 = sand.u32 1, %s3141_s26  }
  0x55   : > { %p78_p10 = por %p4074_p5, %p76_p2  ;;  %s3415_s16 = sshll.u32 %s4063_s27, 4 }
  0x56   : > { %p3406_p7 = por %p4146_p9, %p76_p2  ;;  %s3418_s14 = sshll.u32 %s3157_s30, 8 }
  0x57   : > { %p3422_p12 = pnand %p4073_p3, %p78_p10  ;;  %s4150_s1 = sld [smem:[#allocation58_spill]] }
  0x58   : > { %2464 = dma.hbm_to_vmem [thread:$0]  (!%p3370_p13), %s4145_s11, 128, %s536_s24, [#allocation18], %s4059_s18, %s4059_s18, %s4061_s28  }
  0x59   : > { %s4147_s7 = scalar_select %p3406_p7, 1, 0 }
  0x5a   : > { %s3427_s18 = sand.u32 1, %s3161_s0   ;;  %s587_s27 = scalar_lea.vmem [#allocation5], %s3415_s16 }
  0x5b   : > { %4148 = sst [smem:[#allocation53_spill]] %s4147_s7  ;;  %s594_s8 = sshll.u32 %s587_s27, 4  ;;  %s595_s8 = int_to_ptr.vmem [resolvable:$true] %s594_s8 }
  0x5c   : > { %s4075_s11 = scalar_lea.sflag [#allocation6], %s3427_s18  ;;  %p4093_p2 = pneg %p3422_p12 }
  0x5d   : > { %s593_s9 = scalar_lea.hbm %s4150_s1, %s3418_s14  ;;  %s2688_s7 = scalar_lea.vmem %s595_s8, 256 }
  0x5e   : > { %p2689_p9 = scmp.ne.s32.totalorder %s595_s8, %s2688_s7  ;;  %s3167_s20 = smov [#allocation5]  }
  0x5f   : > { %s2693_s19 = sshll.u32 %s3167_s20, 4  ;;  %s2694_s19 = int_to_ptr.vmem [resolvable:$false] %s2693_s19 }
  0x60   : > { %p2691_p10 = pnand %p2689_p9, %p4093_p2  ;;  %s2695_s25 = scalar_lea.vmem %s2694_s19, 512 }
  0x61   : > { %p2696_p0 = scmp.lt.s32.totalorder %s595_s8, %s2694_s19  ;;  %p2697_p3 = scmp.lt.s32.totalorder %s2695_s25, %s2688_s7 }
  0x62   : > { %p2692_p1 = pneg %p2691_p10 }
  0x63   : > { %p2698_p5 = por %p2697_p3, %p2696_p0 }
  0x65   : > { %p2699_p8 = pnand %p2698_p5, %p2692_p1 }
  0x67   : > { %2702 = shalt.err (!%p2699_p8)
}
  0x68   : > { %s4076_s28 = smov 128   ;;  %s4078_s19 = smov 8  }
  0x69   : > { %2474 = dma.hbm_to_vmem [thread:$0]  (!%p3422_p12), %s593_s9, 256, %s595_s8, %s4075_s11, %s4076_s28, %s4076_s28, %s4078_s19  }
  0x6a   : > { %s123_s25 = sadd.s32 1, %s3129_s23  ;;  %s59_s20 = sadd.s32 1, %s3153_s29 }
  0x6b   : > { %p130_p1 = scmp.ne.s32.totalorder %s3129_s23, %s3125_s22  ;;  %p60_p8 = scmp.ge.s32.totalorder %s59_s20, 2 }
  0x6c   : > { %s606_s15 = sand.u32 1, %s3129_s23   ;;  %p4151_p0 = scmp.eq.s32.totalorder %s3161_s0, 0 }
  0x6d   : > { %p4152_p3 = scmp.eq.s32.totalorder %s3329_s17, 3  ;;  %s4233_s20 = smov (%p60_p8, %s59_s20), 0 }
  0x6e   : > { %p132_p5 = por %p130_p1, %p4151_p0  ;;  %4155 = sst [smem:[#allocation55_spill]] %s4233_s20 }
  0x6f   : > { %p3456_p9 = por %p4152_p3, %p130_p1  ;;  %s4156_s27 = sadd.s32 1, %s3157_s30 }
  0x70   : > { %s4235_s27 = smov (!%p60_p8, %s4156_s27), %s3157_s30  ;;  %s119_s8 = ssub.s32 %s3153_s29, %s4233_s20 }
  0x71   : > { %s4153_s7 = scalar_select %p3456_p9, 1, 0 }
  0x72   : > { %s3467_s9 = sshll.u32 %s606_s15, 4  ;;  %p64_p10 = scmp.ge.s32.totalorder %s4235_s27, 2 }
  0x73   : > { %4154 = sst [smem:[#allocation54_spill]] %s4153_s7  ;;  %s2200_s11 = sshll.u32 %s3153_s29, 1 }
  0x74   : > { %s2201_s28 = sshll.u32 %s3157_s30, 2  ;;  %p4157_p1 = scmp.lt.s32.totalorder %s3161_s0, 4 }
  0x75   : > { %s4237_s27 = smov (%p64_p10, %s4235_s27), 0  ;;  %s614_s1 = sadd.s32 %s2201_s28, %s2200_s11 }
  0x76   : > { %p3473_p0 = pnand %p4157_p1, %p132_p5  ;;  %4159 = sst [smem:[#allocation56_spill]] %s4237_s27 }
  0x77   : > { %s66_s7 = ssub.s32 %s3157_s30, %s4237_s27  ;;  %s3481_s20 = sshll.u32 %s614_s1, 7 }
  0x78   : > { %p67_p8 = scmp.eq.s32.totalorder %s66_s7, 0  ;;  %s120_s15 = sor.u32 %s119_s8, %s66_s7 }
  0x79   : > { %p121_p3 = scmp.eq.s32.totalorder %s120_s15, 0  ;;  %s4160_s29 = sadd.s32 1, %s3141_s26 }
  0x7a   : > { %s3486_s22 = scalar_select %p67_p8, %s3141_s26, %s4160_s29  }
  0x7b   : > { %s3489_s0 = scalar_select %p121_p3, %s3129_s23, %s123_s25  }
  0x7c   : > { %s4161_s3 = sld [smem:[#allocation60_spill]]  ;;  %s631_s4 = scalar_lea.vmem [#allocation8], %s3467_s9 }
  0x7d   : > { %s640_s2 = sshll.u32 %s631_s4, 4  ;;  %s4100_s11 = scalar_lea.sflag [#allocation9], %s3427_s18  ;;  %s641_s2 = int_to_ptr.vmem [resolvable:$true] %s640_s2 }
  0x7e   : > { %p4097_p5 = pneg %p3473_p0  ;;  %s2716_s1 = scalar_lea.vmem %s641_s2, 256 }
  0x7f   : > { %p2717_p10 = scmp.ne.s32.totalorder %s641_s2, %s2716_s1  ;;  %s3170_s29 = smov [#allocation8]  }
  0x80   : > { %s2721_s28 = sshll.u32 %s3170_s29, 4  ;;  %s2722_s28 = int_to_ptr.vmem [resolvable:$false] %s2721_s28 }
  0x81   : > { %p2719_p1 = pnand %p2717_p10, %p4097_p5  ;;  %s2723_s25 = scalar_lea.vmem %s2722_s28, 512 }
  0x82   : > { %s639_s6 = scalar_lea.hbm %s4161_s3, %s3481_s20  ;;  %p2724_p8 = scmp.lt.s32.totalorder %s641_s2, %s2722_s28 }
  0x83   : > { %p2720_p2 = pneg %p2719_p1  ;;  %p2725_p3 = scmp.lt.s32.totalorder %s2723_s25, %s2716_s1 }
  0x85   : > { %p2726_p7 = por %p2725_p3, %p2724_p8 }
  0x87   : > { %p2727_p9 = pnand %p2726_p7, %p2720_p2 }
  0x89   : > { %2730 = shalt.err (!%p2727_p9)
}
  0x8a   : > { %s4162_s4 = smov 8   ;;  %s4163_s21 = smov 128  }
  0x8b   : > { %2480 = dma.hbm_to_vmem [thread:$0]  (!%p3473_p0), %s639_s6, 256, %s641_s2, %s4100_s11, %s4163_s21, %s4163_s21, %s4162_s4  }
  0x8c   : > { %s4164_s5 = sld [smem:[#allocation62_spill]]  ;;  %s677_s15 = scalar_lea.vmem [#allocation11], %s3467_s9 }
  0x8d   : > { %s686_s1 = sshll.u32 %s677_s15, 4  ;;  %s4099_s29 = scalar_lea.sflag [#allocation12], %s3427_s18  ;;  %s687_s1 = int_to_ptr.vmem [resolvable:$true] %s686_s1 }
  0x8e   : > { %s2744_s28 = scalar_lea.vmem %s687_s1, 256  ;;  %s3171_s25 = smov [#allocation11]  }
  0x8f   : > { %p2745_p7 = scmp.ne.s32.totalorder %s687_s1, %s2744_s28  ;;  %s2749_s3 = sshll.u32 %s3171_s25, 4  ;;  %s2750_s3 = int_to_ptr.vmem [resolvable:$false] %s2749_s3 }
  0x90   : > { %s2751_s27 = scalar_lea.vmem %s2750_s3, 512  ;;  %p2752_p10 = scmp.lt.s32.totalorder %s687_s1, %s2750_s3 }
  0x91   : > { %p2747_p2 = pnand %p2745_p7, %p4097_p5  ;;  %p2753_p1 = scmp.lt.s32.totalorder %s2751_s27, %s2744_s28 }
  0x92   : > { %s685_s8 = scalar_lea.hbm %s4164_s5, %s3481_s20 }
  0x93   : > { %p2748_p9 = pneg %p2747_p2  ;;  %p2754_p8 = por %p2753_p1, %p2752_p10 }
  0x95   : > { %p2755_p3 = pnand %p2754_p8, %p2748_p9 }
  0x97   : > { %2758 = shalt.err (!%p2755_p3)
}
  0x98   : > { %2486 = dma.hbm_to_vmem [thread:$0]  (!%p3473_p0), %s685_s8, 256, %s687_s1, %s4099_s29, %s4163_s21, %s4163_s21, %s4162_s4  }
  0x99   : > { %s3172_s2 = smov [#allocation16]   ;;  %s3173_s17 = smov [#allocation19]  }
  0x9a   : > { %s522_s6 = sshll.u32 %s3172_s2, 4  ;;  %s548_s7 = sshll.u32 %s3173_s17, 4  ;;  %s523_s6 = int_to_ptr.vmem [resolvable:$true] %s522_s6  ;;  %s549_s7 = int_to_ptr.vmem [resolvable:$true] %s548_s7 }
  0x9b   : > { %s2770_s15 = scalar_lea.vmem %s523_s6, 128  ;;  %p4165_p2 = pneg %p3370_p13 }
  0x9c   : > { %p2771_p7 = scmp.ne.s32.totalorder %s523_s6, %s2770_s15  ;;  %p2778_p1 = scmp.lt.s32.totalorder %s523_s6, %s523_s6 }
  0x9d   : > { %p2779_p8 = scmp.lt.s32.totalorder %s2770_s15, %s2770_s15 }
  0x9e   : > { %p2773_p9 = pnand %p2771_p7, %p4165_p2 }
  0x9f   : > { %p2780_p3 = por %p2779_p8, %p2778_p1 }
  0xa0   : > { %p2774_p10 = pneg %p2773_p9 }
  0xa2   : > { %p2781_p5 = pnand %p2780_p3, %p2774_p10 }
  0xa4   : > { %2784 = shalt.err (!%p2781_p5)
}
  0xa5   : > { %s4166_s3 = smov 4   ;;  %s4167_s27 = smov 64  }
  0xa6   : > { %s4168_s10 = sld [smem:[#allocation67_spill]]  ;;  %s2796_s28 = scalar_lea.vmem %s549_s7, 128 }
  0xa7   : > { %p2797_p6 = scmp.ne.s32.totalorder %s549_s7, %s2796_s28  ;;  %p4169_p7 = pmov %p4165_p2 }
  0xa8   : > { %p2804_p1 = scmp.lt.s32.totalorder %s549_s7, %s549_s7  ;;  %p2805_p10 = scmp.lt.s32.totalorder %s2796_s28, %s2796_s28 }
  0xa9   : > { %p2799_p2 = pnand %p2797_p6, %p4169_p7 }
  0xaa   : > { %p2806_p5 = por %p2805_p10, %p2804_p1 }
  0xab   : > { %p2800_p9 = pneg %p2799_p2 }
  0xac   : > { %2461 = dma.hbm_to_vmem [thread:$0]  (!%p3370_p13), %s4168_s10, 128, %s523_s6, [#allocation15], %s4167_s27, %s4167_s27, %s4166_s3  }
  0xad   : > { %p2807_p8 = pnand %p2806_p5, %p2800_p9 }
  0xaf   : > { %2810 = shalt.err (!%p2807_p8)
}
  0xb0   : > { %s4170_s12 = sld [smem:[#allocation69_spill]]  ;;  %s566_s1 = scalar_lea.vmem [#allocation2], %s3415_s16 }
  0xb1   : > { %s4171_s15 = sld [smem:[#allocation57_spill]]  ;;  %s573_s28 = sshll.u32 %s566_s1, 4  ;;  %s574_s28 = int_to_ptr.vmem [resolvable:$true] %s573_s28 }
  0xb2   : > { %s4172_s11 = sld [smem:[#allocation59_spill]]  ;;  %s4173_s10 = sand.u32 1, %s3141_s26  }
  0xb3   : > { %s563_s30 = scalar_lea.sflag [#allocation3], %s4173_s10  ;;  %s2824_s25 = scalar_lea.vmem %s574_s28, 256 }
  0xb4   : > { %p2825_p6 = scmp.ne.s32.totalorder %s574_s28, %s2824_s25  ;;  %p4174_p3 = pneg %p3422_p12 }
  0xb6   : > { %2467 = dma.hbm_to_vmem [thread:$0]  (!%p3370_p13), %s4170_s12, 128, %s549_s7, [#allocation18], %s4167_s27, %s4167_s27, %s4166_s3  }
  0xb7   : > { %s572_s8 = scalar_lea.hbm %s4171_s15, %s3418_s14  ;;  %p2827_p7 = pnand %p2825_p6, %p4174_p3 }
  0xb8   : > { %s616_s5 = scalar_lea.hbm %s4172_s11, %s3481_s20  ;;  %s3174_s7 = smov [#allocation2]  }
  0xb9   : > { %p2828_p2 = pneg %p2827_p7  ;;  %s2829_s3 = sshll.u32 %s3174_s7, 4  ;;  %s2830_s3 = int_to_ptr.vmem [resolvable:$false] %s2829_s3 }
  0xba   : > { %s2831_s27 = scalar_lea.vmem %s2830_s3, 512  ;;  %p2832_p13 = scmp.lt.s32.totalorder %s574_s28, %s2830_s3 }
  0xbb   : > { %p2833_p9 = scmp.lt.s32.totalorder %s2831_s27, %s2824_s25 }
  0xbd   : > { %p2834_p1 = por %p2833_p9, %p2832_p13 }
  0xbf   : > { %p2835_p10 = pnand %p2834_p1, %p2828_p2 }
  0xc1   : > { %2838 = shalt.err (!%p2835_p10)
}
  0xc2   : > { %2471 = dma.hbm_to_vmem [thread:$0]  (!%p3422_p12), %s572_s8, 256, %s574_s28, %s563_s30, %s4163_s21, %s4163_s21, %s4162_s4  }
  0xc3   : > { %s608_s10 = scalar_lea.vmem [#allocation7], %s3467_s9  ;;  %s4175_s17 = sld [smem:[#allocation61_spill]] }
  0xc4   : > { %s617_s29 = sshll.u32 %s608_s10, 4  ;;  %p4176_p8 = pneg %p3473_p0  ;;  %s618_s29 = int_to_ptr.vmem [resolvable:$true] %s617_s29 }
  0xc5   : > { %s2852_s1 = scalar_lea.vmem %s618_s29, 256  ;;  %s3175_s13 = smov [#allocation7]  }
  0xc6   : > { %p2853_p5 = scmp.ne.s32.totalorder %s618_s29, %s2852_s1  ;;  %s2857_s25 = sshll.u32 %s3175_s13, 4  ;;  %s2858_s25 = int_to_ptr.vmem [resolvable:$false] %s2857_s25 }
  0xc7   : > { %s2859_s7 = scalar_lea.vmem %s2858_s25, 512  ;;  %p2860_p7 = scmp.lt.s32.totalorder %s618_s29, %s2858_s25 }
  0xc8   : > { %p2855_p6 = pnand %p2853_p5, %p4176_p8  ;;  %p2861_p2 = scmp.lt.s32.totalorder %s2859_s7, %s2852_s1 }
  0xc9   : > { %s662_s15 = scalar_lea.hbm %s4175_s17, %s3481_s20 }
  0xca   : > { %p2856_p3 = pneg %p2855_p6  ;;  %p2862_p13 = por %p2861_p2, %p2860_p7 }
  0xcc   : > { %p2863_p9 = pnand %p2862_p13, %p2856_p3 }
  0xce   : > { %2866 = shalt.err (!%p2863_p9)
}
  0xcf   : > { %s4177_s30 = scalar_lea.sflag [#allocation6], %s3427_s18  ;;  %s654_s3 = scalar_lea.vmem [#allocation10], %s3467_s9 }
  0xd0   : > { %2477 = dma.hbm_to_vmem [thread:$0]  (!%p3473_p0), %s616_s5, 256, %s618_s29, %s4177_s30, %s4163_s21, %s4163_s21, %s4162_s4  }
  0xd1   : > { %s663_s27 = sshll.u32 %s654_s3, 4  ;;  %s4178_s6 = sld [smem:[#allocation63_spill]]  ;;  %s664_s27 = int_to_ptr.vmem [resolvable:$true] %s663_s27 }
  0xd2   : > { %s2880_s13 = scalar_lea.vmem %s664_s27, 256  ;;  %p4179_p10 = pmov %p4176_p8 }
  0xd3   : > { %p2881_p1 = scmp.ne.s32.totalorder %s664_s27, %s2880_s13  ;;  %s3176_s25 = smov [#allocation10]  }
  0xd4   : > { %s2885_s7 = sshll.u32 %s3176_s25, 4  ;;  %s2886_s7 = int_to_ptr.vmem [resolvable:$false] %s2885_s7 }
  0xd5   : > { %p2883_p5 = pnand %p2881_p1, %p4179_p10  ;;  %s2887_s8 = scalar_lea.vmem %s2886_s7, 512 }
  0xd6   : > { %p2888_p6 = scmp.lt.s32.totalorder %s664_s27, %s2886_s7  ;;  %p2889_p3 = scmp.lt.s32.totalorder %s2887_s8, %s2880_s13 }
  0xd7   : > { %s706_s1 = scalar_lea.hbm %s4178_s6, %s3418_s14  ;;  %p2884_p8 = pneg %p2883_p5 }
  0xd8   : > { %p2890_p7 = por %p2889_p3, %p2888_p6 }
  0xda   : > { %p2891_p2 = pnand %p2890_p7, %p2884_p8 }
  0xdc   : > { %2894 = shalt.err (!%p2891_p2)
}
  0xdd   : > { %s4180_s5 = scalar_lea.sflag [#allocation9], %s3427_s18  ;;  %s700_s30 = scalar_lea.vmem [#allocation13], %s3415_s16 }
  0xde   : > { %2483 = dma.hbm_to_vmem [thread:$0]  (!%p3473_p0), %s662_s15, 256, %s664_s27, %s4180_s5, %s4163_s21, %s4163_s21, %s4162_s4  }
  0xdf   : > { %s707_s28 = sshll.u32 %s700_s30, 4  ;;  %p4181_p9 = pneg %p3422_p12  ;;  %s708_s28 = int_to_ptr.vmem [resolvable:$true] %s707_s28 }
  0xe0   : > { %s2908_s3 = scalar_lea.vmem %s708_s28, 256  ;;  %s3177_s19 = smov [#allocation13]  }
  0xe1   : > { %p2909_p13 = scmp.ne.s32.totalorder %s708_s28, %s2908_s3  ;;  %s2913_s10 = sshll.u32 %s3177_s19, 4  ;;  %s2914_s10 = int_to_ptr.vmem [resolvable:$false] %s2913_s10 }
  0xe2   : > { %s2915_s2 = scalar_lea.vmem %s2914_s10, 512  ;;  %p2916_p5 = scmp.lt.s32.totalorder %s708_s28, %s2914_s10 }
  0xe3   : > { %p2911_p1 = pnand %p2909_p13, %p4181_p9  ;;  %p2917_p8 = scmp.lt.s32.totalorder %s2915_s2, %s2908_s3 }
  0xe5   : > { %p2912_p10 = pneg %p2911_p1  ;;  %p2918_p6 = por %p2917_p8, %p2916_p5 }
  0xe7   : > { %p2919_p3 = pnand %p2918_p6, %p2912_p10 }
  0xe9   : > { %2922 = shalt.err (!%p2919_p3)
}
  0xea   : > { %s4182_s16 = scalar_lea.sflag [#allocation12], %s3427_s18  ;;  %719 = sbr.rel (%p3362_p11) target bundleno = 1264 (0x4f0), region = 72 }
  0xeb   : > { %2489 = dma.hbm_to_vmem [thread:$0]  (!%p3422_p12), %s706_s1, 256, %s708_s28, %s4182_s16, %s4163_s21, %s4163_s21, %s4162_s4  }
  0xec   : > { %s4184_s13 = sld [smem:[#allocation41_spill]] (!%p3362_p11) }
  0xf2   : > { %s3625_s7 = sand.u32 1, %s4184_s13  }
  0xf3   : > { %s3628_s24 = sshll.u32 %s3625_s7, 4  ;;  %s722_s8 = scalar_lea.sflag [#allocation3], %s3625_s7 }
  0xf4   : > { %s725_s18 = scalar_lea.vmem [#allocation2], %s3628_s24 }
  0xf5   : > { %3072 = dma.done.wait (%p3340_p4), %s722_s8, 256  }
  0xf6   : > { %3074 = vsyncadd (%p3340_p4), %s722_s8, 4294967040  ;;  %s4186_s14 = sld [smem:[#allocation47_spill]]  ;;  %s734_s1 = scalar_lea.vmem [#allocation5], %s3628_s24 }
  0xfc   : > { %s3637_s4 = sand.u32 1, %s4186_s14  }
  0xfd   : > { %s731_s21 = scalar_lea.sflag [#allocation6], %s3637_s4 }
  0xfe   : > { %3076 = dma.done.wait (%p3340_p4), %s731_s21, 256  }
  0xff   : > { %3078 = vsyncadd (%p3340_p4), %s731_s21, 4294967040  ;;  %s4187_s5 = sld [smem:[#allocation39_spill]] }
 0x100   : > { %s4188_s9 = sld [smem:[#allocation49_spill]] }
 0x105   : > { %s3646_s29 = sand.u32 1, %s4187_s5  }
 0x106   : > { %s3649_s30 = sshll.u32 %s3646_s29, 4  ;;  %p4189_p11 = scmp.ne.s32.totalorder %s4188_s9, 0 }
 0x107   : > { %s743_s28 = scalar_lea.vmem [#allocation7], %s3649_s30 }
 0x108   : > { %3080 = dma.done.wait (%p4189_p11), %s731_s21, 256  }
 0x109   : > { %3082 = vsyncadd (%p4189_p11), %s731_s21, 4294967040  ;;  %s749_s3 = scalar_lea.sflag [#allocation9], %s3637_s4  ;;  %s752_s19 = scalar_lea.vmem [#allocation8], %s3649_s30 }
 0x10a   : > { %3084 = dma.done.wait (%p4189_p11), %s749_s3, 512  }
 0x10b   : > { %3086 = vsyncadd (%p4189_p11), %s749_s3, 4294966784  ;;  %s761_s10 = scalar_lea.vmem [#allocation10], %s3649_s30  ;;  %s767_s2 = scalar_lea.sflag [#allocation12], %s3637_s4 }
 0x10c   : > { %s770_s16 = scalar_lea.vmem [#allocation11], %s3649_s30 }
 0x10d   : > { %3088 = dma.done.wait (%p4189_p11), %s767_s2, 256  }
 0x10e   : > { %3090 = vsyncadd (%p4189_p11), %s767_s2, 4294967040  ;;  %s779_s20 = scalar_lea.vmem [#allocation13], %s3628_s24 }
 0x10f   : > { %3092 = dma.done.wait (%p3340_p4), %s767_s2, 256  }
 0x110   : > { %3094 = vsyncadd (%p3340_p4), %s767_s2, 4294967040  ;;  %p4190_p12 = scmp.eq.s32.totalorder %s4186_s14, 0 }
 0x112   : > { %3096 = dma.done.wait (%p4190_p12), [#allocation15], 256   ;;  %p4191_p0 = pmov %p4190_p12 }
 0x114   : > { %3098 = vsyncadd (%p4191_p0), [#allocation15], 4294967040  ;;  %p4192_p7 = pmov %p4191_p0 }
 0x115   : > { %p4193_p2 = pmov %p4191_p0 }
 0x116   : > { %3100 = dma.done.wait (%p4192_p7), [#allocation18], 256  }
 0x117   : > { %3102 = vsyncadd (%p4193_p2), [#allocation18], 4294967040  ;;  %v3178_v0 = vmov 0.0   ;;  %vm3179_vm0 = vmmov 0   ;;  %v890_v1 = vld [vmem:[%s725_s18] sm:$0xff]  ;;  %v891_v2 = vld [vmem:[%s725_s18 + $0x8] sm:$0xff] }
 0x118   : > { %2321 = vmatprep.subr.bf16.mxu0 %v3178_v0  ;;  %2327 = vmatprep.subr.bf16.mxu1 %v3178_v0  ;;  %v892_v3 = vld [vmem:[%s734_s1] sm:$0xff]  ;;  %v893_v4 = vld [vmem:[%s734_s1 + $0x8] sm:$0xff]  ;;  %s4194_s13 = sld [smem:[#allocation64_spill]]  ;;  %vm927_vm1 = vcmask 130048   ;;  %s2230_s25 = sshll.u32 %s3646_s29, 3  ;;  %vm1299_vm2 = vcmask 125952  }
 0x119   : > { %2323 = vmatprep.mubr.msk.bf16.mxu0 %vm3179_vm0, %v3178_v0  ;;  %2329 = vmatprep.mubr.msk.bf16.mxu1 %vm3179_vm0, %v3178_v0  ;;  %v3696_v5 = vld [vmem:[%s743_s28] sm:$0xff]  ;;  %v3698_v6 = vld [vmem:[%s743_s28 + $0x8] sm:$0xff]  ;;  %s3756_s8 = scalar_lea.vmem [#allocation20], %s2230_s25  ;;  %s3768_s18 = scalar_lea.vmem [#allocation21], %s2230_s25 }
 0x11a   : > { %v3700_v7 = vld [vmem:[%s752_s19] sm:$0xff]  ;;  %v3702_v8 = vld [vmem:[%s752_s19 + $0x8] sm:$0xff]  ;;  %v900_v9 = vmul.f32 %v3696_v5, %v890_v1  ;;  %v901_v10 = vmul.f32 %v3698_v6, %v891_v2  ;;  %v908_v11 = vmul.f32 %v3696_v5, %v892_v3  ;;  %v909_v12 = vmul.f32 %v3698_v6, %v893_v4  ;;  %s4195_s9 = sld [smem:[#allocation66_spill]]  ;;  %s3817_s30 = scalar_lea.vmem [#allocation23], %s3628_s24 }
 0x11b   : > { %v902_v13 = vmul.f32 %v3700_v7, %v892_v3  ;;  %v903_v14 = vmul.f32 %v3702_v8, %v893_v4  ;;  %v906_v15 = vmul.f32 %v3700_v7, %v890_v1  ;;  %v907_v16 = vmul.f32 %v3702_v8, %v891_v2  ;;  %v2616_v24 = vld [vmem:[#allocation14] sm:$0xff]   ;;  %v2617_v25 = vld [vmem:[#allocation16] sm:$0xff]   ;;  %v2618_v26 = vld [vmem:[#allocation17] sm:$0xff]   ;;  %s3820_s28 = scalar_lea.vmem [#allocation24], %s3628_s24  ;;  %s4196_s3 = sld [smem:[#allocation42_spill]] }
 0x11c   : > { %v898_v53 = vld [vmem:[%s779_s20] sm:$0xff]  ;;  %v899_v62 = vld [vmem:[%s779_s20 + $0x8] sm:$0xff] }
 0x11d   : > { %v904_v17 = vsub.f32 %v900_v9, %v902_v13  ;;  %v905_v18 = vsub.f32 %v901_v10, %v903_v14  ;;  %v910_v19 = vadd.f32 %v908_v11, %v906_v15  ;;  %v911_v20 = vadd.f32 %v909_v12, %v907_v16  ;;  %v1314_v61 = vld [vmem:[%s761_s10] sm:$0xff]  ;;  %v1315_v3 = vld [vmem:[%s761_s10 + $0x8] sm:$0xff] }
 0x11e   : > { %v2615_v21 = vld [vmem:[%s4194_s13] sm:$0xff]  }
 0x11f   : > { %v912_v22 = vpack.c.bf16 %v905_v18, %v904_v17  ;;  %v913_v23 = vpack.c.bf16 %v911_v20, %v910_v19 }
 0x121   : > { %2322 = vmatpush3.bf16.msra.mxu0 %v912_v22  ;;  %2328 = vmatpush3.bf16.msra.mxu1 %v913_v23  ;;  %p2262_p4 = scmp.ne.s32.totalorder %s4196_s3, 0 }
 0x122   : > { %2333 = vmatprep.subr.bf16.mxu0 %v3178_v0  ;;  %2339 = vmatprep.subr.bf16.mxu1 %v3178_v0 }
 0x124   : > { %2324 = vmatmul.mubr.msk.bf16.vlgmr.msra.gmra.mxu0 %vm927_vm1, %v2615_v21  ;;  %2330 = vmatmul.mubr.msk.bf16.vlgmr.msra.gmra.mxu1 %vm927_vm1, %v2616_v24 }
 0x125   : > { %2334 = vmatpush3.bf16.msra.mxu0 %v912_v22  ;;  %2340 = vmatpush3.bf16.msra.mxu1 %v913_v23 }
 0x126   : > { %2335 = vmatprep.mubr.msk.bf16.mxu0 %vm3179_vm0, %v3178_v0  ;;  %2341 = vmatprep.mubr.msk.bf16.mxu1 %vm3179_vm0, %v3178_v0 }
 0x127   : > { %2345 = vmatprep.subr.bf16.mxu0 %v3178_v0  ;;  %2351 = vmatprep.subr.bf16.mxu1 %v3178_v0 }
 0x12c   : > { %2336 = vmatmul.mubr.msk.bf16.vlgmr.msra.gmra.mxu0 %vm927_vm1, %v2616_v24  ;;  %2342 = vmatmul.mubr.msk.bf16.vlgmr.msra.gmra.mxu1 %vm927_vm1, %v2615_v21  ;;  %v1322_v21 = vld [vmem:[%s770_s16] sm:$0xff] }
 0x12d   : > { %2347 = vmatprep.mubr.msk.bf16.mxu0 %vm3179_vm0, %v3178_v0  ;;  %2353 = vmatprep.mubr.msk.bf16.mxu1 %vm3179_vm0, %v3178_v0 }
 0x12e   : > { %2346 = vmatpush3.bf16.msra.mxu0 %v2617_v25  ;;  %2352 = vmatpush3.bf16.msra.mxu1 %v2618_v26 }
 0x12f   : > { %2357 = vmatprep.subr.bf16.mxu0 %v3178_v0  ;;  %2363 = vmatprep.subr.bf16.mxu1 %v3178_v0 }
 0x1e4   : > { %v965_v27 = vpop.f32.mrf.mxu0  ;;  %v1014_v28 = vpop.f32.mrf.mxu1 }
 0x1e5   : > { %v1021_v33 = vsub.f32 %v965_v27, %v1014_v28  ;;  %v2619_v27 = vld [vmem:[%s4194_s13] sm:$0xff]  }
 0x1e6   : > { %v2325_v29 = vpop.f32.mrf.mxu0  ;;  %v2331_v30 = vpop.f32.mrf.mxu1 }
 0x1e8   : > { %v968_v31 = vpop.f32.mrf.mxu0  ;;  %v1017_v32 = vpop.f32.mrf.mxu1 }
 0x1e9   : > { %v1022_v34 = vsub.f32 %v968_v31, %v1017_v32 }
 0x1ea   : > { %v2326_v35 = vpop.f32.mrf.mxu0  ;;  %v2332_v36 = vpop.f32.mrf.mxu1 }
 0x1eb   : > { %v1105_v37 = vpack.c.bf16 %v1022_v34, %v1021_v33  ;;  %v2620_v35 = vld [vmem:[%s4195_s9] sm:$0xff]   ;;  %v2621_v36 = vld [vmem:[#allocation16] sm:$0xff]  }
 0x1ec   : > { %v1057_v38 = vpop.f32.mrf.mxu0  ;;  %v1098_v39 = vpop.f32.mrf.mxu1 }
 0x1ed   : > { %2348 = vmatmul.mubr.msk.bf16.vlgmr.msra.gmra.mxu0 %vm927_vm1, %v1105_v37  ;;  %v1099_v44 = vadd.f32 %v1098_v39, %v1057_v38 }
 0x1ee   : > { %v2337_v40 = vpop.f32.mrf.mxu0  ;;  %v2343_v41 = vpop.f32.mrf.mxu1  ;;  %2358 = vmatpush3.bf16.msra.mxu0 %v2617_v25  ;;  %2359 = vmatprep.mubr.msk.bf16.mxu0 %vm3179_vm0, %v3178_v0  ;;  %v1323_v25 = vld [vmem:[%s770_s16 + $0x8] sm:$0xff] }
 0x1ef   : > { %2369 = vmatprep.subr.bf16.mxu0 %v3178_v0 }
 0x1f0   : > { %v1060_v42 = vpop.f32.mrf.mxu0  ;;  %v1101_v43 = vpop.f32.mrf.mxu1 }
 0x1f1   : > { %v1102_v45 = vadd.f32 %v1101_v43, %v1060_v42 }
 0x1f2   : > { %v2338_v46 = vpop.f32.mrf.mxu0  ;;  %v2344_v47 = vpop.f32.mrf.mxu1 }
 0x1f3   : > { %v1106_v48 = vpack.c.bf16 %v1102_v45, %v1099_v44 }
 0x1f5   : > { %2354 = vmatmul.mubr.msk.bf16.vlgmr.msra.gmra.mxu1 %vm927_vm1, %v1106_v48  ;;  %2360 = vmatmul.mubr.msk.bf16.vlgmr.msra.gmra.mxu0 %vm927_vm1, %v1106_v48 }
 0x1f6   : > { %2364 = vmatpush3.bf16.msra.mxu1 %v2618_v26  ;;  %2365 = vmatprep.mubr.msk.bf16.mxu1 %vm3179_vm0, %v3178_v0 }
 0x1f7   : > { %2371 = vmatprep.mubr.msk.bf16.mxu0 %vm3179_vm0, %v3178_v0  ;;  %2375 = vmatprep.subr.bf16.mxu1 %v3178_v0 }
 0x1fd   : > { %2366 = vmatmul.mubr.msk.bf16.vlgmr.msra.gmra.mxu1 %vm927_vm1, %v1105_v37  ;;  %v2622_v37 = vld [vmem:[#allocation19] sm:$0xff]  }
 0x1fe   : > { %2377 = vmatprep.mubr.msk.bf16.mxu1 %vm3179_vm0, %v3178_v0 }
 0x2ad   : > { %v1150_v49 = vpop.f32.mrf.mxu0 }
 0x2af   : > { %v2349_v50 = vpop.f32.mrf.mxu0 }
 0x2b1   : > { %v1153_v51 = vpop.f32.mrf.mxu0 }
 0x2b3   : > { %v2350_v52 = vpop.f32.mrf.mxu0 }
 0x2b5   : > { %v1200_v54 = vpop.f32.mrf.mxu1  ;;  %v1243_v55 = vpop.f32.mrf.mxu0 }
 0x2b6   : > { %v1207_v56 = vsub.f32 %v1150_v49, %v1200_v54 }
 0x2b7   : > { %v2355_v57 = vpop.f32.mrf.mxu1  ;;  %v2361_v58 = vpop.f32.mrf.mxu0 }
 0x2b8   : > { %v2283_v59 = vpack.c.bf16 %v1207_v56, %v1207_v56  ;;  %v1312_v60 = vmul.f32 %v1207_v56, %v898_v53 }
 0x2b9   : > { %v1203_v63 = vpop.f32.mrf.mxu1  ;;  %v1246_v1 = vpop.f32.mrf.mxu0 }
 0x2ba   : > { %1300 = vst.msk [vmem:[%s3756_s8] sm:$0xf] %vm1299_vm2, %v2283_v59  ;;  %v1208_v2 = vsub.f32 %v1153_v51, %v1203_v63  ;;  %v1316_v10 = vsub.f32 %v1312_v60, %v1314_v61 }
 0x2bb   : > { %v2356_v4 = vpop.f32.mrf.mxu1  ;;  %v2362_v9 = vpop.f32.mrf.mxu0 }
 0x2bc   : > { %v2284_v11 = vpack.c.bf16 %v1208_v2, %v1208_v2  ;;  %v1313_v12 = vmul.f32 %v1208_v2, %v899_v62  ;;  %v1318_v17 = vmul.f32 %v1316_v10, %v898_v53 }
 0x2bd   : > { %v1284_v13 = vpop.f32.mrf.mxu1 }
 0x2be   : > { %1301 = vst.msk [vmem:[%s3756_s8 + $0x4] sm:$0xf] %vm1299_vm2, %v2284_v11  ;;  %v1317_v14 = vsub.f32 %v1313_v12, %v1315_v3  ;;  %v1285_v15 = vadd.f32 %v1284_v13, %v1243_v55 }
 0x2bf   : > { %v2367_v16 = vpop.f32.mrf.mxu1 }
 0x2c0   : > { %v1319_v18 = vmul.f32 %v1317_v14, %v899_v62  ;;  %v2285_v19 = vpack.c.bf16 %v1285_v15, %v1285_v15  ;;  %v1320_v20 = vmul.f32 %v1285_v15, %v898_v53 }
 0x2c1   : > { %v1287_v22 = vpop.f32.mrf.mxu1 }
 0x2c2   : > { %1310 = vst.msk [vmem:[%s3768_s18] sm:$0xf] %vm1299_vm2, %v2285_v19  ;;  %v1288_v23 = vadd.f32 %v1287_v22, %v1246_v1  ;;  %v1328_v24 = vpack.c.bf16 %v1319_v18, %v1318_v17  ;;  %v1324_v28 = vsub.f32 %v1320_v20, %v1322_v21 }
 0x2c3   : > { %v2368_v26 = vpop.f32.mrf.mxu1 }
 0x2c4   : > { %v2286_v29 = vpack.c.bf16 %v1288_v23, %v1288_v23  ;;  %v1321_v30 = vmul.f32 %v1288_v23, %v899_v62  ;;  %2370 = vmatpush3.bf16.msra.mxu0 %v1328_v24  ;;  %v1326_v32 = vmul.f32 %v1324_v28, %v898_v53 }
 0x2c5   : > { %2381 = vmatprep.subr.bf16.mxu0 %v3178_v0 }
 0x2c6   : > { %1311 = vst.msk [vmem:[%s3768_s18 + $0x4] sm:$0xf] %vm1299_vm2, %v2286_v29  ;;  %v1325_v31 = vsub.f32 %v1321_v30, %v1323_v25 }
 0x2c7   : > { %2372 = vmatmul.mubr.msk.bf16.vlgmr.msra.gmra.mxu0 %vm927_vm1, %v2619_v27 }
 0x2c8   : > { %v1327_v33 = vmul.f32 %v1325_v31, %v899_v62  ;;  %2382 = vmatpush3.bf16.msra.mxu0 %v1328_v24  ;;  %2383 = vmatprep.mubr.msk.bf16.mxu0 %vm3179_vm0, %v3178_v0 }
 0x2c9   : > { %2393 = vmatprep.subr.bf16.mxu0 %v3178_v0 }
 0x2ca   : > { %v1329_v34 = vpack.c.bf16 %v1327_v33, %v1326_v32 }
 0x2cc   : > { %2376 = vmatpush3.bf16.msra.mxu1 %v1329_v34 }
 0x2cd   : > { %2387 = vmatprep.subr.bf16.mxu1 %v3178_v0 }
 0x2cf   : > { %2378 = vmatmul.mubr.msk.bf16.vlgmr.msra.gmra.mxu1 %vm927_vm1, %v2620_v35  ;;  %2384 = vmatmul.mubr.msk.bf16.vlgmr.msra.gmra.mxu0 %vm927_vm1, %v2620_v35 }
 0x2d0   : > { %2388 = vmatpush3.bf16.msra.mxu1 %v1329_v34  ;;  %2389 = vmatprep.mubr.msk.bf16.mxu1 %vm3179_vm0, %v3178_v0 }
 0x2d1   : > { %2395 = vmatprep.mubr.msk.bf16.mxu0 %vm3179_vm0, %v3178_v0  ;;  %2399 = vmatprep.subr.bf16.mxu1 %v3178_v0 }
 0x2d2   : > { %2394 = vmatpush3.bf16.msra.mxu0 %v2621_v36 }
 0x2d3   : > { %2405 = vmatprep.subr.bf16.mxu0 %v3178_v0 }
 0x2d7   : > { %2390 = vmatmul.mubr.msk.bf16.vlgmr.msra.gmra.mxu1 %vm927_vm1, %v2619_v27 }
 0x2d8   : > { %2401 = vmatprep.mubr.msk.bf16.mxu1 %vm3179_vm0, %v3178_v0  ;;  %2400 = vmatpush3.bf16.msra.mxu1 %v2622_v37 }
 0x2d9   : > { %2411 = vmatprep.subr.bf16.mxu1 %v3178_v0 }
 0x387   : > { %v1380_v38 = vpop.f32.mrf.mxu0 }
 0x389   : > { %v2373_v39 = vpop.f32.mrf.mxu0 }
 0x38b   : > { %v1383_v40 = vpop.f32.mrf.mxu0 }
 0x38d   : > { %v2374_v41 = vpop.f32.mrf.mxu0 }
 0x38f   : > { %v1429_v42 = vpop.f32.mrf.mxu1  ;;  %v1472_v43 = vpop.f32.mrf.mxu0 }
 0x390   : > { %v1436_v48 = vsub.f32 %v1380_v38, %v1429_v42 }
 0x391   : > { %v2379_v44 = vpop.f32.mrf.mxu1  ;;  %v2385_v45 = vpop.f32.mrf.mxu0 }
 0x393   : > { %v1432_v46 = vpop.f32.mrf.mxu1  ;;  %v1475_v47 = vpop.f32.mrf.mxu0 }
 0x394   : > { %v1437_v49 = vsub.f32 %v1383_v40, %v1432_v46 }
 0x395   : > { %v2380_v50 = vpop.f32.mrf.mxu1  ;;  %v2386_v51 = vpop.f32.mrf.mxu0 }
 0x396   : > { %v1520_v52 = vpack.c.bf16 %v1437_v49, %v1436_v48 }
 0x397   : > { %v1513_v53 = vpop.f32.mrf.mxu1 }
 0x398   : > { %2396 = vmatmul.mubr.msk.bf16.vlgmr.msra.gmra.mxu0 %vm927_vm1, %v1520_v52  ;;  %v1514_v56 = vadd.f32 %v1513_v53, %v1472_v43 }
 0x399   : > { %v2391_v54 = vpop.f32.mrf.mxu1  ;;  %2406 = vmatpush3.bf16.msra.mxu0 %v2621_v36  ;;  %2407 = vmatprep.mubr.msk.bf16.mxu0 %vm3179_vm0, %v3178_v0 }
 0x39b   : > { %v1516_v55 = vpop.f32.mrf.mxu1 }
 0x39c   : > { %v1517_v57 = vadd.f32 %v1516_v55, %v1475_v47 }
 0x39d   : > { %v2392_v58 = vpop.f32.mrf.mxu1 }
 0x39e   : > { %v1521_v59 = vpack.c.bf16 %v1517_v57, %v1514_v56 }
 0x3a0   : > { %2402 = vmatmul.mubr.msk.bf16.vlgmr.msra.gmra.mxu1 %vm927_vm1, %v1521_v59  ;;  %2408 = vmatmul.mubr.msk.bf16.vlgmr.msra.gmra.mxu0 %vm927_vm1, %v1521_v59 }
 0x3a1   : > { %2412 = vmatpush3.bf16.msra.mxu1 %v2622_v37  ;;  %2413 = vmatprep.mubr.msk.bf16.mxu1 %vm3179_vm0, %v3178_v0 }
 0x3a8   : > { %2414 = vmatmul.mubr.msk.bf16.vlgmr.msra.gmra.mxu1 %vm927_vm1, %v1520_v52 }
 0x458   : > { %v1565_v60 = vpop.f32.mrf.mxu0 }
 0x45a   : > { %v2397_v61 = vpop.f32.mrf.mxu0 }
 0x45c   : > { %v1568_v62 = vpop.f32.mrf.mxu0 }
 0x45e   : > { %v2398_v63 = vpop.f32.mrf.mxu0 }
 0x460   : > { %v1615_v1 = vpop.f32.mrf.mxu1  ;;  %v1658_v2 = vpop.f32.mrf.mxu0 }
 0x461   : > { %v1622_v11 = vsub.f32 %v1565_v60, %v1615_v1 }
 0x462   : > { %v2403_v3 = vpop.f32.mrf.mxu1  ;;  %v2409_v4 = vpop.f32.mrf.mxu0 }
 0x463   : > { %v1706_v16 = vmul.f32 %v1622_v11, %v3696_v5  ;;  %v1714_v17 = vmul.f32 %v1622_v11, %v3700_v7 }
 0x464   : > { %v1618_v9 = vpop.f32.mrf.mxu1  ;;  %v1661_v10 = vpop.f32.mrf.mxu0 }
 0x465   : > { %v1623_v18 = vsub.f32 %v1568_v62, %v1618_v9 }
 0x466   : > { %v2404_v12 = vpop.f32.mrf.mxu1  ;;  %v2410_v13 = vpop.f32.mrf.mxu0 }
 0x467   : > { %v1707_v26 = vmul.f32 %v1623_v18, %v3698_v6  ;;  %v1715_v27 = vmul.f32 %v1623_v18, %v3702_v8 }
 0x468   : > { %v1699_v14 = vpop.f32.mrf.mxu1 }
 0x469   : > { %v1700_v15 = vadd.f32 %v1699_v14, %v1658_v2 }
 0x46a   : > { %v2415_v0 = vpop.f32.mrf.mxu1 }
 0x46b   : > { %v1708_v19 = vmul.f32 %v1700_v15, %v3700_v7  ;;  %v1712_v20 = vmul.f32 %v1700_v15, %v3696_v5 }
 0x46c   : > { %v1702_v21 = vpop.f32.mrf.mxu1 }
 0x46d   : > { %v1710_v22 = vadd.f32 %v1708_v19, %v1706_v16  ;;  %v1716_v23 = vsub.f32 %v1712_v20, %v1714_v17  ;;  %v1703_v24 = vadd.f32 %v1702_v21, %v1661_v10  ;;  %1721 = sbr.rel (%p2262_p4) target bundleno = 1140 (0x474), region = 120 }
 0x46e   : > { %v2416_v25 = vpop.f32.mrf.mxu1 }
 0x46f   : > { %v1709_v28 = vmul.f32 %v1703_v24, %v3702_v8  ;;  %v1713_v29 = vmul.f32 %v1703_v24, %v3698_v6 }
 0x471   : > { %v1711_v30 = vadd.f32 %v1709_v28, %v1707_v26  ;;  %v1717_v31 = vsub.f32 %v1713_v29, %v1715_v27 }
 0x472   : > { %1722 = vst.msk [vmem:[%s3817_s30] sm:$0xff] %vm927_vm1, %v1710_v22  ;;  %1724 = vst.msk [vmem:[%s3820_s28] sm:$0xff] %vm927_vm1, %v1716_v23 }
 0x473   : > { %1723 = vst.msk [vmem:[%s3817_s30 + $0x8] sm:$0xff] %vm927_vm1, %v1711_v30  ;;  %1725 = vst.msk [vmem:[%s3820_s28 + $0x8] sm:$0xff] %vm927_vm1, %v1717_v31 }
 0x474 PF: > { %s4197_s19 = sld [smem:[#allocation42_spill]] }
 0x47a   : > { %p2263_p13 = scmp.le.s32.totalorder %s4197_s19, 0 }
 0x47c   : > { %1729 = sbr.rel (%p2263_p13) target bundleno = 1158 (0x486), region = 124 }
 0x481   : > { %v1730_v5 = vld [vmem:[%s3817_s30] sm:$0xff]  ;;  %v1731_v6 = vld [vmem:[%s3817_s30 + $0x8] sm:$0xff] }
 0x482   : > { %v1736_v7 = vld [vmem:[%s3820_s28] sm:$0xff]  ;;  %v1732_v8 = vadd.f32 %v1730_v5, %v1710_v22  ;;  %v1733_v32 = vadd.f32 %v1731_v6, %v1711_v30  ;;  %v1737_v34 = vld [vmem:[%s3820_s28 + $0x8] sm:$0xff] }
 0x483   : > { %v1738_v33 = vadd.f32 %v1736_v7, %v1716_v23  ;;  %v1739_v35 = vadd.f32 %v1737_v34, %v1717_v31 }
 0x484   : > { %1734 = vst.msk [vmem:[%s3817_s30] sm:$0xff] %vm927_vm1, %v1732_v8  ;;  %1735 = vst.msk [vmem:[%s3817_s30 + $0x8] sm:$0xff] %vm927_vm1, %v1733_v32 }
 0x485   : > { %1740 = vst.msk [vmem:[%s3820_s28] sm:$0xff] %vm927_vm1, %v1738_v33  ;;  %1741 = vst.msk [vmem:[%s3820_s28 + $0x8] sm:$0xff] %vm927_vm1, %v1739_v35 }
 0x486 PF: > { %s4198_s24 = sld [smem:[#allocation42_spill]]  ;;  %s1791_s25 = sshll.u32 %s3768_s18, 4  ;;  %s3857_s25 = int_to_ptr.vmem [resolvable:$true] %s1791_s25 }
 0x487   : > { %s4199_s10 = sld [smem:[#allocation43_spill]]  ;;  %s1748_s9 = scalar_lea.sflag [#allocation22], %s3637_s4 }
 0x488   : > { %s4200_s2 = sld [smem:[#allocation54_spill]]  ;;  %s2923_s3 = scalar_lea.vmem %s3857_s25, 128 }
 0x489   : > { %s4201_s1 = sld [smem:[#allocation71_spill]]  ;;  %p2924_p9 = scmp.ne.s32.totalorder %s3857_s25, %s2923_s3 }
 0x48a   : > { %s3180_s19 = smov [#allocation21]  }
 0x48c   : > { %s2268_s16 = sshll.u32 %s4198_s24, 1  ;;  %s2927_s24 = sshll.u32 %s3180_s19, 4  ;;  %s2928_s24 = int_to_ptr.vmem [resolvable:$false] %s2927_s24 }
 0x48d   : > { %s2269_s20 = sshll.u32 %s4199_s10, 2  ;;  %s2929_s18 = scalar_lea.vmem %s2928_s24, 256 }
 0x48e   : > { %s3846_s15 = sadd.s32 %s2269_s20, %s2268_s16  ;;  %p4202_p1 = scmp.ne.s32.totalorder %s4200_s2, 0 }
 0x48f   : > { %s4102_s27 = sshll.u32 %s3846_s15, 6  ;;  %p2930_p8 = scmp.lt.s32.totalorder %s3857_s25, %s2928_s24 }
 0x490   : > { %s3855_s5 = scalar_lea.hbm %s4201_s1, %s4102_s27  ;;  %p2925_p10 = pnand %p2924_p9, %p4202_p1 }
 0x491   : > { %p2931_p6 = scmp.lt.s32.totalorder %s2929_s18, %s2923_s3 }
 0x492   : > { %p2926_p5 = pneg %p2925_p10 }
 0x493   : > { %p2932_p3 = por %p2931_p6, %p2930_p8 }
 0x495   : > { %p2933_p11 = pnand %p2932_p3, %p2926_p5 }
 0x497   : > { %2936 = shalt.err (!%p2933_p11)
}
 0x498   : > { %s2937_s16 = scalar_lea.hbm %s3855_s5, 128  ;;  %s2941_s21 = scalar_lea.hbm %s4201_s1, 512 }
 0x499   : > { %p2938_p12 = scmp.ne.s32.totalorder %s3855_s5, %s2937_s16  ;;  %p2942_p2 = scmp.lt.s32.totalorder %s3855_s5, %s4201_s1 }
 0x49a   : > { %p2943_p4 = scmp.lt.s32.totalorder %s2941_s21, %s2937_s16 }
 0x49b   : > { %p2939_p0 = pnand %p2938_p12, %p4202_p1 }
 0x49c   : > { %p2944_p13 = por %p2943_p4, %p2942_p2 }
 0x49d   : > { %p2940_p7 = pneg %p2939_p0 }
 0x49f   : > { %p2945_p9 = pnand %p2944_p13, %p2940_p7 }
 0x4a1   : > { %2948 = shalt.err (!%p2945_p9)
}
 0x4a2   : > { %s3181_s3 = smov 64   ;;  %s3182_s24 = smov 4  }
 0x4a3   : > { %2448 = dma.vmem_to_hbm [thread:$0]  (%p4202_p1), %s3857_s25, 128, %s3855_s5, %s1748_s9, %s3181_s3, %s3181_s3, %s3182_s24  }
 0x4a4   : > { %s4203_s27 = sshll.u32 %s3846_s15, 6  ;;  %s4204_s20 = sld [smem:[#allocation70_spill]] }
 0x4a5   : > { %s1773_s21 = sshll.u32 %s3756_s8, 4  ;;  %s2287_s19 = sshll.u32 %s4199_s10, 8  ;;  %s3894_s21 = int_to_ptr.vmem [resolvable:$true] %s1773_s21 }
 0x4a6   : > { %s4205_s11 = sld [smem:[#allocation72_spill]]  ;;  %s1743_s25 = scalar_lea.sflag [#allocation4], %s3646_s29 }
 0x4a7   : > { %s2949_s15 = scalar_lea.vmem %s3894_s21, 128  ;;  %s3183_s5 = smov [#allocation20]  }
 0x4a8   : > { %p2950_p10 = scmp.ne.s32.totalorder %s3894_s21, %s2949_s15  ;;  %s2953_s8 = sshll.u32 %s3183_s5, 4  ;;  %s2954_s8 = int_to_ptr.vmem [resolvable:$false] %s2953_s8 }
 0x4a9   : > { %p2956_p6 = scmp.lt.s32.totalorder %s3894_s21, %s2954_s8 }
 0x4aa   : > { %s3890_s14 = scalar_lea.hbm %s4204_s20, %s4203_s27  ;;  %p2951_p5 = pnand %p2950_p10, %p4202_p1 }
 0x4ab   : > { %s2955_s27 = scalar_lea.vmem %s2954_s8, 256 }
 0x4ac   : > { %s3901_s12 = scalar_lea.hbm %s4205_s11, %s2287_s19  ;;  %p2952_p8 = pneg %p2951_p5 }
 0x4ad   : > { %p2957_p3 = scmp.lt.s32.totalorder %s2955_s27, %s2949_s15 }
 0x4af   : > { %p2958_p11 = por %p2957_p3, %p2956_p6 }
 0x4b1   : > { %p2959_p12 = pnand %p2958_p11, %p2952_p8 }
 0x4b3   : > { %2962 = shalt.err (!%p2959_p12)
}
 0x4b4   : > { %s2963_s6 = scalar_lea.hbm %s3890_s14, 128  ;;  %s2967_s18 = scalar_lea.hbm %s4204_s20, 512 }
 0x4b5   : > { %p2964_p0 = scmp.ne.s32.totalorder %s3890_s14, %s2963_s6  ;;  %p2968_p4 = scmp.lt.s32.totalorder %s3890_s14, %s4204_s20 }
 0x4b6   : > { %p2969_p13 = scmp.lt.s32.totalorder %s2967_s18, %s2963_s6 }
 0x4b7   : > { %p2965_p7 = pnand %p2964_p0, %p4202_p1 }
 0x4b8   : > { %p2970_p9 = por %p2969_p13, %p2968_p4 }
 0x4b9   : > { %p2966_p2 = pneg %p2965_p7 }
 0x4bb   : > { %p2971_p10 = pnand %p2970_p9, %p2966_p2 }
 0x4bd   : > { %2974 = shalt.err (!%p2971_p10)
}
 0x4be   : > { %s4206_s15 = sld [smem:[#allocation53_spill]]  ;;  %s1807_s8 = sshll.u32 %s3817_s30, 4  ;;  %s3928_s8 = int_to_ptr.vmem [resolvable:$true] %s1807_s8 }
 0x4bf   : > { %2447 = dma.vmem_to_hbm [thread:$0]  (%p4202_p1), %s3894_s21, 128, %s3890_s14, %s1743_s25, %s3181_s3, %s3181_s3, %s3182_s24  }
 0x4c0   : > { %s2975_s27 = scalar_lea.vmem %s3928_s8, 256  ;;  %s3184_s2 = smov [#allocation23]  }
 0x4c1   : > { %p2976_p5 = scmp.ne.s32.totalorder %s3928_s8, %s2975_s27  ;;  %s2979_s6 = sshll.u32 %s3184_s2, 4  ;;  %s2980_s6 = int_to_ptr.vmem [resolvable:$false] %s2979_s6 }
 0x4c2   : > { %s2981_s29 = scalar_lea.vmem %s2980_s6, 512  ;;  %p2982_p11 = scmp.lt.s32.totalorder %s3928_s8, %s2980_s6 }
 0x4c3   : > { %p2983_p12 = scmp.lt.s32.totalorder %s2981_s29, %s2975_s27 }
 0x4c4   : > { %p4207_p8 = scmp.ne.s32.totalorder %s4206_s15, 0 }
 0x4c5   : > { %p2984_p0 = por %p2983_p12, %p2982_p11 }
 0x4c6   : > { %p2977_p6 = pnand %p2976_p5, %p4207_p8 }
 0x4c8   : > { %p2978_p3 = pneg %p2977_p6 }
 0x4ca   : > { %p2985_p7 = pnand %p2984_p0, %p2978_p3 }
 0x4cc   : > { %2988 = shalt.err (!%p2985_p7)
}
 0x4cd   : > { %s2989_s30 = scalar_lea.hbm %s3901_s12, 256  ;;  %s2993_s14 = scalar_lea.hbm %s4205_s11, 512 }
 0x4ce   : > { %p2990_p1 = scmp.ne.s32.totalorder %s3901_s12, %s2989_s30  ;;  %p2994_p13 = scmp.lt.s32.totalorder %s3901_s12, %s4205_s11 }
 0x4cf   : > { %p2995_p9 = scmp.lt.s32.totalorder %s2993_s14, %s2989_s30 }
 0x4d0   : > { %p2991_p2 = pnand %p2990_p1, %p4207_p8 }
 0x4d1   : > { %p2996_p10 = por %p2995_p9, %p2994_p13 }
 0x4d2   : > { %p2992_p4 = pneg %p2991_p2 }
 0x4d4   : > { %p2997_p5 = pnand %p2996_p10, %p2992_p4 }
 0x4d6   : > { %3000 = shalt.err (!%p2997_p5)
}
 0x4d7   : > { %s3185_s1 = smov 128   ;;  %s3186_s18 = smov 8  }
 0x4d8   : > { %2449 = dma.vmem_to_hbm [thread:$0]  (%p4207_p8), %s3928_s8, 256, %s3901_s12, %s1748_s9, %s3185_s1, %s3185_s1, %s3186_s18  }
 0x4d9   : > { %s4208_s27 = sld [smem:[#allocation73_spill]]  ;;  %s1823_s29 = sshll.u32 %s3820_s28, 4  ;;  %s3963_s29 = int_to_ptr.vmem [resolvable:$true] %s1823_s29 }
 0x4da   : > { %s1758_s30 = scalar_lea.sflag [#allocation25], %s3625_s7  ;;  %s3001_s3 = scalar_lea.vmem %s3963_s29, 256 }
 0x4db   : > { %p3002_p6 = scmp.ne.s32.totalorder %s3963_s29, %s3001_s3  ;;  %s3187_s4 = smov [#allocation24]  }
 0x4dc   : > { %s3005_s12 = sshll.u32 %s3187_s4, 4  ;;  %s3006_s12 = int_to_ptr.vmem [resolvable:$false] %s3005_s12 }
 0x4dd   : > { %p3003_p3 = pnand %p3002_p6, %p4207_p8  ;;  %s3007_s10 = scalar_lea.vmem %s3006_s12, 512 }
 0x4de   : > { %p3008_p12 = scmp.lt.s32.totalorder %s3963_s29, %s3006_s12  ;;  %p3009_p0 = scmp.lt.s32.totalorder %s3007_s10, %s3001_s3 }
 0x4df   : > { %s4209_s2 = smov %s4208_s27  ;;  %s3960_s6 = scalar_lea.hbm %s4208_s27, %s2287_s19 }
 0x4e0   : > { %p3004_p11 = pneg %p3003_p3  ;;  %p3010_p7 = por %p3009_p0, %p3008_p12 }
 0x4e2   : > { %p3011_p1 = pnand %p3010_p7, %p3004_p11 }
 0x4e4   : > { %3014 = shalt.err (!%p3011_p1)
}
 0x4e5   : > { %s3015_s28 = scalar_lea.hbm %s3960_s6, 256  ;;  %s3019_s19 = scalar_lea.hbm %s4209_s2, 512 }
 0x4e6   : > { %p3016_p2 = scmp.ne.s32.totalorder %s3960_s6, %s3015_s28  ;;  %p3020_p9 = scmp.lt.s32.totalorder %s3960_s6, %s4209_s2 }
 0x4e7   : > { %p3021_p10 = scmp.lt.s32.totalorder %s3019_s19, %s3015_s28 }
 0x4e8   : > { %p3017_p4 = pnand %p3016_p2, %p4207_p8 }
 0x4e9   : > { %p3022_p5 = por %p3021_p10, %p3020_p9 }
 0x4ea   : > { %p3018_p13 = pneg %p3017_p4 }
 0x4ec   : > { %p3023_p6 = pnand %p3022_p5, %p3018_p13 }
 0x4ee   : > { %3026 = shalt.err (!%p3023_p6)
}
 0x4ef   : > { %2450 = dma.vmem_to_hbm [thread:$0]  (%p4207_p8), %s3963_s29, 256, %s3960_s6, %s1758_s30, %s3185_s1, %s3185_s1, %s3186_s18  }
 0x4f0 PF: > { %s4210_s14 = sld [smem:[#allocation46_spill]] }
 0x4f1   : > { %s4211_s21 = sld [smem:[#allocation38_spill]] }
 0x4f2   : > { %s4212_s25 = sld [smem:[#allocation50_spill]] }
 0x4f6   : > { %p2512_p3 = scmp.ge.s32.totalorder %s4210_s14, 2 }
 0x4f7   : > { %s1838_s16 = sand.u32 1, %s4211_s21  }
 0x4f8   : > { %p4213_p11 = scmp.ne.s32.totalorder %s4212_s25, 0  ;;  %s1839_s5 = scalar_lea.sflag [#allocation4], %s1838_s16 }
 0x4fa   : > { %p2491_p12 = pnand %p2512_p3, %p4213_p11 }
 0x4fc   : > { %p2492_p0 = pneg %p2491_p12 }
 0x4fe   : > { %3104 = dma.done.wait (%p2492_p0), %s1839_s5, 128  }
 0x4ff   : > { %3106 = vsyncadd (%p2492_p0), %s1839_s5, 4294967168  ;;  %s4214_s15 = sadd.s32 4294967294, %s4210_s14  }
 0x500   : > { %s1847_s27 = sand.u32 1, %s4214_s15  }
 0x501   : > { %s1848_s3 = scalar_lea.sflag [#allocation22], %s1847_s27 }
 0x502   : > { %3108 = dma.done.wait (%p2492_p0), %s1848_s3, 128  }
 0x503   : > { %3110 = vsyncadd (%p2492_p0), %s1848_s3, 4294967168  ;;  %s4215_s4 = sld [smem:[#allocation51_spill]] }
 0x509   : > { %p4216_p8 = scmp.ne.s32.totalorder %s4215_s4, 0 }
 0x50b   : > { %p2497_p7 = pnand %p2512_p3, %p4216_p8 }
 0x50d   : > { %p2498_p1 = pneg %p2497_p7 }
 0x50f   : > { %3112 = dma.done.wait (%p2498_p1), %s1848_s3, 256  }
 0x510   : > { %3114 = vsyncadd (%p2498_p1), %s1848_s3, 4294967040  ;;  %s4217_s1 = sld [smem:[#allocation40_spill]] }
 0x516   : > { %s1865_s18 = sand.u32 1, %s4217_s1  }
 0x517   : > { %s1866_s6 = scalar_lea.sflag [#allocation25], %s1865_s18 }
 0x518   : > { %3116 = dma.done.wait (%p2498_p1), %s1866_s6, 256  }
 0x519   : > { %3118 = vsyncadd (%p2498_p1), %s1866_s6, 4294967040  ;;  %s50_s12 = sadd.s32 1, %s4210_s14   ;;  %s4218_s21 = sld [smem:[#allocation39_spill]] }
 0x51a   : > { %p47_p2 = scmp.ge.s32.totalorder %s50_s12, 6   ;;  %s4219_s24 = sld [smem:[#allocation41_spill]] }
 0x51b   : > { %s4220_s29 = smov %s3486_s22  ;;  %s4221_s27 = sld [smem:[#allocation44_spill]] }
 0x51c   : > { %s4222_s28 = sld [smem:[#allocation45_spill]]  ;;  %s4225_s22 = smov %s3129_s23 }
 0x51d   : > { %s4223_s30 = sld [smem:[#allocation55_spill]]  ;;  %s4226_s23 = smov %s3489_s0 }
 0x51e   : > { %s4224_s10 = sld [smem:[#allocation56_spill]]  ;;  %s4227_s25 = smov %s3141_s26 }
 0x51f   : > { %s4228_s26 = smov %s4220_s29  ;;  %s4231_s0 = smov %s50_s12 }
 0x520   :  { %49 = sbr.rel (!%p47_p2) target bundleno = 39 (0x27), region = 262 }
 0x523   : > { %s4229_s29 = smov %s4223_s30 }
 0x524   : > { %s4230_s30 = smov %s4224_s10 }
 0x525   :  { %1871 = vsyncpa [#allocation3], 1 }
 0x526   :  { %1873 = vsyncpa [#allocation3 + $0x1], 1 }
 0x527   :  { %1874 = vsyncpa [#allocation6], 1 }
 0x528   :  { %1876 = vsyncpa [#allocation6 + $0x1], 1 }
 0x529   :  { %1877 = vsyncpa [#allocation9], 1 }
 0x52a   :  { %1879 = vsyncpa [#allocation9 + $0x1], 1 }
 0x52b   :  { %1880 = vsyncpa [#allocation12], 1 }
 0x52c   :  { %1882 = vsyncpa [#allocation12 + $0x1], 1 }
 0x52d   :  { %1883 = vsyncpa [#allocation15], 1 }
 0x52e   :  { %1884 = vsyncpa [#allocation18], 1 }
 0x52f   :  { %1885 = vsyncpa [#allocation4], 1 }
 0x530   :  { %1887 = vsyncpa [#allocation4 + $0x1], 1 }
 0x531   :  { %1888 = vsyncpa [#allocation22], 1 }
 0x532   :  { %1890 = vsyncpa [#allocation22 + $0x1], 1 }
 0x533   :  { %1891 = vsyncpa [#allocation25], 1 }
 0x534   :  { %1893 = vsyncpa [#allocation25 + $0x1], 1 }

</bundles_post_ra>
